<compile_context>
chip_gen: v7x
topology: tpu7x:2x2x1
jax: 0.10.0
libtpu: 0.0.40
codegen_flags: <defaults>
</compile_context>

<pallas_src>
import functools

import jax
import jax.numpy as jnp
from jax.experimental import pallas as pl
from jax.experimental.pallas import tpu as pltpu


# ----------------------------- shared helpers --------------------------------
def _gelu_tanh(x):
    # TODO(synk): PyTorch nn.GELU() default is the exact erf form; the tanh
    # approximation (max abs deviation ~3e-4) is used for guaranteed Mosaic
    # lowering (erf is not in the TPU transcendental set).
    c = jnp.sqrt(2.0 / jnp.pi).astype(x.dtype)
    return 0.5 * x * (1.0 + jnp.tanh(c * (x + 0.044715 * x * x * x)))


def _layernorm(x, w, b, eps=1e-5):
    # Two-pass variance (centered) for better numerical stability; the centered
    # tensor is needed for the output anyway so the extra cost is one multiply.
    mean = jnp.mean(x, axis=-1, keepdims=True)
    c = x - mean
    var = jnp.mean(c * c, axis=-1, keepdims=True)
    inv = jax.lax.rsqrt(var + eps)
    return c * inv * w + b


# ------------------------- one-time parameter prep ----------------------------
def prepare_params(params, num_heads):
    """Transpose / cast / scale-fold the PyTorch-layout params ONCE.

    Folds 1/sqrt(dh) into the Q columns of w_qkv and b_qkv so the kernel does
    not pay an (R, E) VALU multiply per grid step.
    """
    f32, wdt = jnp.float32, jnp.bfloat16
    E = params["w_o"].shape[0]
    dh = E // num_heads
    scale = 1.0 / (dh ** 0.5)

    w_qkv_t = jnp.asarray(params["w_qkv"], f32).T            # (E, 3E)
    b_qkv = jnp.asarray(params["b_qkv"], f32)                 # (3E,)
    col_scale = jnp.concatenate(
        [jnp.full((E,), scale, f32), jnp.ones((2 * E,), f32)])
    w_qkv_t = w_qkv_t * col_scale[None, :]
    b_qkv = b_qkv * col_scale

    return {
        "w_qkv": w_qkv_t.astype(wdt),
        "b_qkv": b_qkv.reshape(1, -1),
        "w_o": jnp.asarray(params["w_o"], f32).T.astype(wdt),
        "b_o": jnp.asarray(params["b_o"], f32).reshape(1, -1),
        "ln1_w": jnp.asarray(params["ln1_w"], f32).reshape(1, -1),
        "ln1_b": jnp.asarray(params["ln1_b"], f32).reshape(1, -1),
        "w1": jnp.asarray(params["w1"], f32).T.astype(wdt),
        "b1": jnp.asarray(params["b1"], f32).reshape(1, -1),
        "w2": jnp.asarray(params["w2"], f32).T.astype(wdt),
        "b2": jnp.asarray(params["b2"], f32).reshape(1, -1),
        "ln2_w": jnp.asarray(params["ln2_w"], f32).reshape(1, -1),
        "ln2_b": jnp.asarray(params["ln2_b"], f32).reshape(1, -1),
    }


# --------------------------------- kernel ------------------------------------
def encoder_layer_kernel(num_heads, bn, seq_len,
                         x_ref, wqkv_ref, bqkv_ref, wo_ref, bo_ref,
                         ln1w_ref, ln1b_ref, w1_ref, b1_ref,
                         w2_ref, b2_ref, ln2w_ref, ln2b_ref,
                         o_ref):
    """Processes a (bn*seq_len, E) block of rows (batch-major, seq-minor)."""
    R, E = x_ref.shape                               # R = bn * seq_len
    H = num_heads
    dh = E // H
    bf16 = jnp.bfloat16

    x = x_ref[...].astype(jnp.float32)               # (R, E) f32 activations

    # ---- QKV projection: one (R,E)x(E,3E) bf16 matmul, f32 accumulate ----
    # (1/sqrt(dh) is pre-folded into the Q columns of wqkv/bqkv.)
    qkv = jnp.dot(x.astype(bf16), wqkv_ref[...],
                  preferred_element_type=jnp.float32) + bqkv_ref[...]
    q = qkv[:, :E]
    k = qkv[:, E:2 * E]
    v = qkv[:, 2 * E:]

    # ---- multi-head self attention ----
    # Static loop over heads only (small); the batch dimension is handled by a
    # single batched einsum per head (canonical flash pattern).
    # TODO(synk): for long sequences, switch to a KV-tiled (flash-style) inner
    # pipeline so the (bn, L, L) score tile never exceeds VMEM (matters first
    # on v7x's 64 MiB VMEM).
    ctx_heads = []
    for h in range(H):
        c0 = h * dh
        qh = q[:, c0:c0 + dh].reshape(bn, seq_len, dh).astype(bf16)
        kh = k[:, c0:c0 + dh].reshape(bn, seq_len, dh).astype(bf16)
        vh = v[:, c0:c0 + dh].reshape(bn, seq_len, dh).astype(bf16)
        s = jnp.einsum('bqd,bkd->bqk', qh, kh,
                       preferred_element_type=jnp.float32)
        s = s - jnp.max(s, axis=-1, keepdims=True)
        p = jnp.exp(s)
        p = p / jnp.sum(p, axis=-1, keepdims=True)   # exact softmax denom
        ctx_h = jnp.einsum('bqk,bkd->bqd', p.astype(bf16), vh,
                           preferred_element_type=jnp.float32)
        ctx_heads.append(ctx_h.reshape(R, dh).astype(bf16))
    # Assemble the full (R, E) context once (lane-dense), already in bf16 —
    # it only ever feeds the bf16 out-projection.
    ctx = jnp.concatenate(ctx_heads, axis=-1)

    # ---- output projection + residual + LayerNorm 1 ----
    attn = jnp.dot(ctx, wo_ref[...],
                   preferred_element_type=jnp.float32) + bo_ref[...]
    x1 = _layernorm(x + attn, ln1w_ref[...], ln1b_ref[...])

    # ---- MLP: Linear -> GELU -> (Dropout=id) -> Linear -> (Dropout=id) ----
    h1 = jnp.dot(x1.astype(bf16), w1_ref[...],
                 preferred_element_type=jnp.float32) + b1_ref[...]
    h1 = _gelu_tanh(h1)
    mlp = jnp.dot(h1.astype(bf16), w2_ref[...],
                  preferred_element_type=jnp.float32) + b2_ref[...]

    # ---- residual + LayerNorm 2 ----
    out = _layernorm(x1 + mlp, ln2w_ref[...], ln2b_ref[...])
    o_ref[...] = out.astype(o_ref.dtype)


# ----------------------------- tiling heuristics -------------------------------
def _vmem_limit_bytes():
    """Generation-aware VMEM limit: ~84% of physical, conservative fallback."""
    try:
        phys = int(pltpu.get_tpu_info().vmem_capacity_bytes)
    except Exception:
        phys = 64 * 1024 * 1024                      # v7x-safe fallback
    return max(32 * 1024 * 1024, min((phys * 27) // 32, 112 * 1024 * 1024))


def _pick_batch_block(N, L, E, mlp_dim, num_heads, vmem_limit):
    """Pick bn so R = bn*L fills the MXU M dim without blowing VMEM.

    Keeps >= 2 grid steps whenever N >= 2 so the "parallel" batch axis can
    shard across the two TensorCores on v7x (near-free on v5e/v6e).
    """
    if L % 8 != 0:
        # Block second-minor dim must be 8-aligned unless it spans the array.
        return N
    # Rough f32 working-set bytes per row (x, qkv, residuals, mlp hidden,
    # per-row share of the (L,L) scores) — only a heuristic.
    per_row = 4 * (6 * E + mlp_dim + num_heads * L) + 2 * E
    budget_rows = max(L, (vmem_limit // 3) // max(per_row, 1))
    target_rows = min(1024, max(128, budget_rows))
    divisors = [d for d in range(1, N + 1) if N % d == 0]
    min_steps = 2 if N >= 2 else 1
    cands = [d for d in divisors if N // d >= min_steps] or divisors
    fit = [d for d in cands if d * L <= target_rows]
    return max(fit) if fit else min(cands)


# -------------------------------- wrapper -------------------------------------
def transformer_encoder_layer(x, prepared, num_heads, batch_block=None):
    """x: (L, N, E) like PyTorch MultiheadAttention. `prepared` from prepare_params.

    Returns (L, N, E) in x.dtype (pass bf16 activations to halve HBM traffic;
    all softmax/LN/GELU math is done in f32 inside the kernel).
    """
    L, N, E = x.shape
    assert E % num_heads == 0
    mlp_dim = prepared["w1"].shape[1]
    vmem_limit = _vmem_limit_bytes()

    if batch_block is None:
        batch_block = _pick_batch_block(N, L, E, mlp_dim, num_heads, vmem_limit)
    bn = batch_block
    assert N % bn == 0, "batch must be divisible by the batch block"
    if bn != N:
        assert L % 8 == 0, "seq_len must be a multiple of 8 when tiling batch"
    R = bn * L

    # Flatten to (N*L, E) rows (batch-major) so every dense op is a 2-D matmul.
    x2 = jnp.transpose(x, (1, 0, 2)).reshape(N * L, E)

    args = [
        x2,
        prepared["w_qkv"], prepared["b_qkv"],
        prepared["w_o"], prepared["b_o"],
        prepared["ln1_w"], prepared["ln1_b"],
        prepared["w1"], prepared["b1"],
        prepared["w2"], prepared["b2"],
        prepared["ln2_w"], prepared["ln2_b"],
    ]

    def build(single_buffer_weights):
        if single_buffer_weights:
            def wspec(a):
                return pl.BlockSpec(a.shape, lambda b: (0, 0),
                                    pipeline_mode=pl.Buffered(1))
        else:
            def wspec(a):
                return pl.BlockSpec(a.shape, lambda b: (0, 0))
        in_specs = [pl.BlockSpec((R, E), lambda b: (b, 0))]
        in_specs += [wspec(a) for a in args[1:]]     # grid-invariant params
        return pl.pallas_call(
            functools.partial(encoder_layer_kernel, num_heads, bn, L),
            grid=(N // bn,),
            in_specs=in_specs,
            out_specs=pl.BlockSpec((R, E), lambda b: (b, 0)),
            out_shape=jax.ShapeDtypeStruct((N * L, E), x.dtype),
            compiler_params=pltpu.CompilerParams(
                dimension_semantics=("parallel",),
                vmem_limit_bytes=vmem_limit,
            ),
        )

    try:
        out2 = build(True)(*args)
    except Exception:
        # Fallback: this JAX version rejects single-buffered (Buffered(1))
        # invariant-weight specs — rebuild with default double buffering.
        out2 = build(False)(*args)

    return jnp.transpose(out2.reshape(N, L, E), (1, 0, 2))   # back to (L, N, E)


# ----------------------- pure-JAX reference (for check) -----------------------
def reference(x, prepared, num_heads):
    """Mirrors the kernel numerics (prepared bf16 weights, f32 accumulation)."""
    L, N, E = x.shape
    dh = E // num_heads
    bf16 = jnp.bfloat16

    def per_batch(xb):                                 # xb: (L, E) f32
        qkv = jnp.dot(xb.astype(bf16), prepared["w_qkv"],
                      preferred_element_type=jnp.float32) + prepared["b_qkv"]
        q, k, v = qkv[:, :E], qkv[:, E:2 * E], qkv[:, 2 * E:]
        ctx_heads = []
        for h in range(num_heads):
            sl = slice(h * dh, (h + 1) * dh)
            s = jnp.dot(q[:, sl].astype(bf16), k[:, sl].astype(bf16).T,
                        preferred_element_type=jnp.float32)
            p = jax.nn.softmax(s, axis=-1)
            ctx_heads.append(jnp.dot(p.astype(bf16), v[:, sl].astype(bf16),
                                     preferred_element_type=jnp.float32
                                     ).astype(bf16))
        ctx = jnp.concatenate(ctx_heads, axis=-1)
        attn = jnp.dot(ctx, prepared["w_o"],
                       preferred_element_type=jnp.float32) + prepared["b_o"]
        x1 = _layernorm(xb + attn, prepared["ln1_w"], prepared["ln1_b"])
        h1 = _gelu_tanh(jnp.dot(x1.astype(bf16), prepared["w1"],
                                preferred_element_type=jnp.float32)
                        + prepared["b1"])
        mlp = jnp.dot(h1.astype(bf16), prepared["w2"],
                      preferred_element_type=jnp.float32) + prepared["b2"]
        return _layernorm(x1 + mlp, prepared["ln2_w"], prepared["ln2_b"])

    out = jax.vmap(per_batch)(jnp.transpose(x, (1, 0, 2)))
    return jnp.transpose(out, (1, 0, 2))


# ---------------------------------- main ---------------------------------------
if __name__ == "__main__":
    L, N, E, H, MLP = 8, 2, 32, 4, 64                  # seq, batch, embed, heads, mlp_dim
    key = jax.random.PRNGKey(0)
    ks = jax.random.split(key, 10)
    s = 0.02
    raw_params = {
        "w_qkv": jax.random.normal(ks[0], (3 * E, E), jnp.float32) * s,
        "b_qkv": jax.random.normal(ks[1], (3 * E,), jnp.float32) * s,
        "w_o":   jax.random.normal(ks[2], (E, E), jnp.float32) * s,
        "b_o":   jax.random.normal(ks[3], (E,), jnp.float32) * s,
        "ln1_w": jnp.ones((E,), jnp.float32),
        "ln1_b": jnp.zeros((E,), jnp.float32),
        "w1":    jax.random.normal(ks[4], (MLP, E), jnp.float32) * s,
        "b1":    jax.random.normal(ks[5], (MLP,), jnp.float32) * s,
        "w2":    jax.random.normal(ks[6], (E, MLP), jnp.float32) * s,
        "b2":    jax.random.normal(ks[7], (E,), jnp.float32) * s,
        "ln2_w": jnp.ones((E,), jnp.float32),
        "ln2_b": jnp.zeros((E,), jnp.float32),
    }
    x = jax.random.normal(ks[8], (L, N, E), jnp.float32)

    prepared = prepare_params(raw_params, H)           # one-time prep (hoisted)

    out = jax.block_until_ready(transformer_encoder_layer(x, prepared, H))
    ref = reference(x, prepared, H)

    assert out.shape == (L, N, E), out.shape
    max_err = float(jnp.max(jnp.abs(out - ref)))
    assert max_err < 2e-3, f"mismatch vs reference: {max_err}"
    print("KERNEL_OK")
</pallas_src>

<mosaic_0001>
module attributes {stable_mosaic.version = 11 : i64} {
  func.func @encoder_layer_kernel(%arg0: i32, %arg1: memref<8x32xf32, #tpu.memory_space<vmem>>, %arg2: memref<32x96xbf16, #tpu.memory_space<vmem>>, %arg3: memref<1x96xf32, #tpu.memory_space<vmem>>, %arg4: memref<32x32xbf16, #tpu.memory_space<vmem>>, %arg5: memref<1x32xf32, #tpu.memory_space<vmem>>, %arg6: memref<1x32xf32, #tpu.memory_space<vmem>>, %arg7: memref<1x32xf32, #tpu.memory_space<vmem>>, %arg8: memref<32x64xbf16, #tpu.memory_space<vmem>>, %arg9: memref<1x64xf32, #tpu.memory_space<vmem>>, %arg10: memref<64x32xbf16, #tpu.memory_space<vmem>>, %arg11: memref<1x32xf32, #tpu.memory_space<vmem>>, %arg12: memref<1x32xf32, #tpu.memory_space<vmem>>, %arg13: memref<1x32xf32, #tpu.memory_space<vmem>>, %arg14: memref<8x32xf32, #tpu.memory_space<vmem>>) attributes {dimension_semantics = [#tpu.dimension_semantics<parallel>], iteration_bounds = array<i64: 2>, scalar_prefetch = 0 : i64, scratch_operands = 0 : i64, tpu.core_type = #tpu.core_type<tc>, window_params = [{transform_indices = @transform_0, window_bounds = array<i64: 8, 32>}, {pipeline_mode = #tpu.pipeline_mode<synchronous>, transform_indices = @transform_1, window_bounds = array<i64: 32, 96>}, {pipeline_mode = #tpu.pipeline_mode<synchronous>, transform_indices = @transform_2, window_bounds = array<i64: 1, 96>}, {pipeline_mode = #tpu.pipeline_mode<synchronous>, transform_indices = @transform_3, window_bounds = array<i64: 32, 32>}, {pipeline_mode = #tpu.pipeline_mode<synchronous>, transform_indices = @transform_4, window_bounds = array<i64: 1, 32>}, {pipeline_mode = #tpu.pipeline_mode<synchronous>, transform_indices = @transform_5, window_bounds = array<i64: 1, 32>}, {pipeline_mode = #tpu.pipeline_mode<synchronous>, transform_indices = @transform_6, window_bounds = array<i64: 1, 32>}, {pipeline_mode = #tpu.pipeline_mode<synchronous>, transform_indices = @transform_7, window_bounds = array<i64: 32, 64>}, {pipeline_mode = #tpu.pipeline_mode<synchronous>, transform_indices = @transform_8, window_bounds = array<i64: 1, 64>}, {pipeline_mode = #tpu.pipeline_mode<synchronous>, transform_indices = @transform_9, window_bounds = array<i64: 64, 32>}, {pipeline_mode = #tpu.pipeline_mode<synchronous>, transform_indices = @transform_10, window_bounds = array<i64: 1, 32>}, {pipeline_mode = #tpu.pipeline_mode<synchronous>, transform_indices = @transform_11, window_bounds = array<i64: 1, 32>}, {pipeline_mode = #tpu.pipeline_mode<synchronous>, transform_indices = @transform_12, window_bounds = array<i64: 1, 32>}, {transform_indices = @transform_13, window_bounds = array<i64: 8, 32>}]} {
    %c0 = arith.constant 0 : index
    %c0_0 = arith.constant 0 : index
    %0 = vector.load %arg1[%c0, %c0_0] : memref<8x32xf32, #tpu.memory_space<vmem>>, vector<8x32xf32>
    %1 = arith.truncf %0 : vector<8x32xf32> to vector<8x32xbf16>
    %c0_1 = arith.constant 0 : index
    %c0_2 = arith.constant 0 : index
    %2 = vector.load %arg2[%c0_1, %c0_2] : memref<32x96xbf16, #tpu.memory_space<vmem>>, vector<32x96xbf16>
    %cst = arith.constant dense<0.000000e+00> : vector<8x96xf32>
    %3 = tpu.matmul %1, %2, %cst {dimension_numbers = #tpu.dot_dimension_numbers<[1], [0], [0], [1], [0, 0, 1, 1], [], []>} : vector<8x32xbf16>, vector<32x96xbf16>, vector<8x96xf32> -> vector<8x96xf32>
    %c0_3 = arith.constant 0 : index
    %c0_4 = arith.constant 0 : index
    %4 = vector.load %arg3[%c0_3, %c0_4] : memref<1x96xf32, #tpu.memory_space<vmem>>, vector<1x96xf32>
    %5 = vector.broadcast %4 : vector<1x96xf32> to vector<8x96xf32>
    %6 = arith.addf %3, %5 : vector<8x96xf32>
    %7 = vector.extract_strided_slice %6 {offsets = [0, 0], sizes = [8, 32], strides = [1, 1]} : vector<8x96xf32> to vector<8x32xf32>
    %8 = vector.extract_strided_slice %6 {offsets = [0, 32], sizes = [8, 32], strides = [1, 1]} : vector<8x96xf32> to vector<8x32xf32>
    %9 = vector.extract_strided_slice %6 {offsets = [0, 64], sizes = [8, 32], strides = [1, 1]} : vector<8x96xf32> to vector<8x32xf32>
    %10 = vector.extract_strided_slice %7 {offsets = [0, 0], sizes = [8, 8], strides = [1, 1]} : vector<8x32xf32> to vector<8x8xf32>
    %11 = vector.shape_cast %10 : vector<8x8xf32> to vector<1x8x8xf32>
    %12 = arith.truncf %11 : vector<1x8x8xf32> to vector<1x8x8xbf16>
    %13 = vector.extract_strided_slice %8 {offsets = [0, 0], sizes = [8, 8], strides = [1, 1]} : vector<8x32xf32> to vector<8x8xf32>
    %14 = vector.shape_cast %13 : vector<8x8xf32> to vector<1x8x8xf32>
    %15 = arith.truncf %14 : vector<1x8x8xf32> to vector<1x8x8xbf16>
    %16 = vector.extract_strided_slice %9 {offsets = [0, 0], sizes = [8, 8], strides = [1, 1]} : vector<8x32xf32> to vector<8x8xf32>
    %17 = vector.shape_cast %16 : vector<8x8xf32> to vector<1x8x8xf32>
    %18 = arith.truncf %17 : vector<1x8x8xf32> to vector<1x8x8xbf16>
    "tpu.trace_start"() <{level = 10 : i32, message = "bqd,bkd->bqk"}> : () -> ()
    %cst_5 = arith.constant dense<0.000000e+00> : vector<1x8x8xf32>
    %19 = tpu.matmul %12, %15, %cst_5 {dimension_numbers = #tpu.dot_dimension_numbers<[2], [2], [1], [1], [0, 0, 0, 1, 1, 1], [0], [0]>} : vector<1x8x8xbf16>, vector<1x8x8xbf16>, vector<1x8x8xf32> -> vector<1x8x8xf32>
    "tpu.trace_stop"() : () -> ()
    %cst_6 = arith.constant dense<0xFF800000> : vector<1x8xf32>
    %20 = vector.multi_reduction <maximumf>, %19, %cst_6 [2] : vector<1x8x8xf32> to vector<1x8xf32>
    %21 = vector.shape_cast %20 : vector<1x8xf32> to vector<1x8x1xf32>
    %22 = vector.broadcast %21 : vector<1x8x1xf32> to vector<1x8x8xf32>
    %23 = arith.subf %19, %22 : vector<1x8x8xf32>
    %24 = math.exp %23 : vector<1x8x8xf32>
    %cst_7 = arith.constant dense<0.000000e+00> : vector<1x8xf32>
    %25 = vector.multi_reduction <add>, %24, %cst_7 [2] : vector<1x8x8xf32> to vector<1x8xf32>
    %26 = vector.shape_cast %25 : vector<1x8xf32> to vector<1x8x1xf32>
    %27 = vector.broadcast %26 : vector<1x8x1xf32> to vector<1x8x8xf32>
    %28 = arith.divf %24, %27 : vector<1x8x8xf32>
    %29 = arith.truncf %28 : vector<1x8x8xf32> to vector<1x8x8xbf16>
    "tpu.trace_start"() <{level = 10 : i32, message = "bqk,bkd->bqd"}> : () -> ()
    %cst_8 = arith.constant dense<0.000000e+00> : vector<1x8x8xf32>
    %30 = tpu.matmul %29, %18, %cst_8 {dimension_numbers = #tpu.dot_dimension_numbers<[2], [1], [1], [2], [0, 0, 0, 1, 1, 2], [0], [0]>} : vector<1x8x8xbf16>, vector<1x8x8xbf16>, vector<1x8x8xf32> -> vector<1x8x8xf32>
    "tpu.trace_stop"() : () -> ()
    %31 = vector.shape_cast %30 : vector<1x8x8xf32> to vector<8x8xf32>
    %32 = arith.truncf %31 : vector<8x8xf32> to vector<8x8xbf16>
    %33 = vector.extract_strided_slice %7 {offsets = [0, 8], sizes = [8, 8], strides = [1, 1]} : vector<8x32xf32> to vector<8x8xf32>
    %34 = vector.shape_cast %33 : vector<8x8xf32> to vector<1x8x8xf32>
    %35 = arith.truncf %34 : vector<1x8x8xf32> to vector<1x8x8xbf16>
    %36 = vector.extract_strided_slice %8 {offsets = [0, 8], sizes = [8, 8], strides = [1, 1]} : vector<8x32xf32> to vector<8x8xf32>
    %37 = vector.shape_cast %36 : vector<8x8xf32> to vector<1x8x8xf32>
    %38 = arith.truncf %37 : vector<1x8x8xf32> to vector<1x8x8xbf16>
    %39 = vector.extract_strided_slice %9 {offsets = [0, 8], sizes = [8, 8], strides = [1, 1]} : vector<8x32xf32> to vector<8x8xf32>
    %40 = vector.shape_cast %39 : vector<8x8xf32> to vector<1x8x8xf32>
    %41 = arith.truncf %40 : vector<1x8x8xf32> to vector<1x8x8xbf16>
    "tpu.trace_start"() <{level = 10 : i32, message = "bqd,bkd->bqk"}> : () -> ()
    %cst_9 = arith.constant dense<0.000000e+00> : vector<1x8x8xf32>
    %42 = tpu.matmul %35, %38, %cst_9 {dimension_numbers = #tpu.dot_dimension_numbers<[2], [2], [1], [1], [0, 0, 0, 1, 1, 1], [0], [0]>} : vector<1x8x8xbf16>, vector<1x8x8xbf16>, vector<1x8x8xf32> -> vector<1x8x8xf32>
    "tpu.trace_stop"() : () -> ()
    %cst_10 = arith.constant dense<0xFF800000> : vector<1x8xf32>
    %43 = vector.multi_reduction <maximumf>, %42, %cst_10 [2] : vector<1x8x8xf32> to vector<1x8xf32>
    %44 = vector.shape_cast %43 : vector<1x8xf32> to vector<1x8x1xf32>
    %45 = vector.broadcast %44 : vector<1x8x1xf32> to vector<1x8x8xf32>
    %46 = arith.subf %42, %45 : vector<1x8x8xf32>
    %47 = math.exp %46 : vector<1x8x8xf32>
    %cst_11 = arith.constant dense<0.000000e+00> : vector<1x8xf32>
    %48 = vector.multi_reduction <add>, %47, %cst_11 [2] : vector<1x8x8xf32> to vector<1x8xf32>
    %49 = vector.shape_cast %48 : vector<1x8xf32> to vector<1x8x1xf32>
    %50 = vector.broadcast %49 : vector<1x8x1xf32> to vector<1x8x8xf32>
    %51 = arith.divf %47, %50 : vector<1x8x8xf32>
    %52 = arith.truncf %51 : vector<1x8x8xf32> to vector<1x8x8xbf16>
    "tpu.trace_start"() <{level = 10 : i32, message = "bqk,bkd->bqd"}> : () -> ()
    %cst_12 = arith.constant dense<0.000000e+00> : vector<1x8x8xf32>
    %53 = tpu.matmul %52, %41, %cst_12 {dimension_numbers = #tpu.dot_dimension_numbers<[2], [1], [1], [2], [0, 0, 0, 1, 1, 2], [0], [0]>} : vector<1x8x8xbf16>, vector<1x8x8xbf16>, vector<1x8x8xf32> -> vector<1x8x8xf32>
    "tpu.trace_stop"() : () -> ()
    %54 = vector.shape_cast %53 : vector<1x8x8xf32> to vector<8x8xf32>
    %55 = arith.truncf %54 : vector<8x8xf32> to vector<8x8xbf16>
    %56 = vector.extract_strided_slice %7 {offsets = [0, 16], sizes = [8, 8], strides = [1, 1]} : vector<8x32xf32> to vector<8x8xf32>
    %57 = vector.shape_cast %56 : vector<8x8xf32> to vector<1x8x8xf32>
    %58 = arith.truncf %57 : vector<1x8x8xf32> to vector<1x8x8xbf16>
    %59 = vector.extract_strided_slice %8 {offsets = [0, 16], sizes = [8, 8], strides = [1, 1]} : vector<8x32xf32> to vector<8x8xf32>
    %60 = vector.shape_cast %59 : vector<8x8xf32> to vector<1x8x8xf32>
    %61 = arith.truncf %60 : vector<1x8x8xf32> to vector<1x8x8xbf16>
    %62 = vector.extract_strided_slice %9 {offsets = [0, 16], sizes = [8, 8], strides = [1, 1]} : vector<8x32xf32> to vector<8x8xf32>
    %63 = vector.shape_cast %62 : vector<8x8xf32> to vector<1x8x8xf32>
    %64 = arith.truncf %63 : vector<1x8x8xf32> to vector<1x8x8xbf16>
    "tpu.trace_start"() <{level = 10 : i32, message = "bqd,bkd->bqk"}> : () -> ()
    %cst_13 = arith.constant dense<0.000000e+00> : vector<1x8x8xf32>
    %65 = tpu.matmul %58, %61, %cst_13 {dimension_numbers = #tpu.dot_dimension_numbers<[2], [2], [1], [1], [0, 0, 0, 1, 1, 1], [0], [0]>} : vector<1x8x8xbf16>, vector<1x8x8xbf16>, vector<1x8x8xf32> -> vector<1x8x8xf32>
    "tpu.trace_stop"() : () -> ()
    %cst_14 = arith.constant dense<0xFF800000> : vector<1x8xf32>
    %66 = vector.multi_reduction <maximumf>, %65, %cst_14 [2] : vector<1x8x8xf32> to vector<1x8xf32>
    %67 = vector.shape_cast %66 : vector<1x8xf32> to vector<1x8x1xf32>
    %68 = vector.broadcast %67 : vector<1x8x1xf32> to vector<1x8x8xf32>
    %69 = arith.subf %65, %68 : vector<1x8x8xf32>
    %70 = math.exp %69 : vector<1x8x8xf32>
    %cst_15 = arith.constant dense<0.000000e+00> : vector<1x8xf32>
    %71 = vector.multi_reduction <add>, %70, %cst_15 [2] : vector<1x8x8xf32> to vector<1x8xf32>
    %72 = vector.shape_cast %71 : vector<1x8xf32> to vector<1x8x1xf32>
    %73 = vector.broadcast %72 : vector<1x8x1xf32> to vector<1x8x8xf32>
    %74 = arith.divf %70, %73 : vector<1x8x8xf32>
    %75 = arith.truncf %74 : vector<1x8x8xf32> to vector<1x8x8xbf16>
    "tpu.trace_start"() <{level = 10 : i32, message = "bqk,bkd->bqd"}> : () -> ()
    %cst_16 = arith.constant dense<0.000000e+00> : vector<1x8x8xf32>
    %76 = tpu.matmul %75, %64, %cst_16 {dimension_numbers = #tpu.dot_dimension_numbers<[2], [1], [1], [2], [0, 0, 0, 1, 1, 2], [0], [0]>} : vector<1x8x8xbf16>, vector<1x8x8xbf16>, vector<1x8x8xf32> -> vector<1x8x8xf32>
    "tpu.trace_stop"() : () -> ()
    %77 = vector.shape_cast %76 : vector<1x8x8xf32> to vector<8x8xf32>
    %78 = arith.truncf %77 : vector<8x8xf32> to vector<8x8xbf16>
    %79 = vector.extract_strided_slice %7 {offsets = [0, 24], sizes = [8, 8], strides = [1, 1]} : vector<8x32xf32> to vector<8x8xf32>
    %80 = vector.shape_cast %79 : vector<8x8xf32> to vector<1x8x8xf32>
    %81 = arith.truncf %80 : vector<1x8x8xf32> to vector<1x8x8xbf16>
    %82 = vector.extract_strided_slice %8 {offsets = [0, 24], sizes = [8, 8], strides = [1, 1]} : vector<8x32xf32> to vector<8x8xf32>
    %83 = vector.shape_cast %82 : vector<8x8xf32> to vector<1x8x8xf32>
    %84 = arith.truncf %83 : vector<1x8x8xf32> to vector<1x8x8xbf16>
    %85 = vector.extract_strided_slice %9 {offsets = [0, 24], sizes = [8, 8], strides = [1, 1]} : vector<8x32xf32> to vector<8x8xf32>
    %86 = vector.shape_cast %85 : vector<8x8xf32> to vector<1x8x8xf32>
    %87 = arith.truncf %86 : vector<1x8x8xf32> to vector<1x8x8xbf16>
    "tpu.trace_start"() <{level = 10 : i32, message = "bqd,bkd->bqk"}> : () -> ()
    %cst_17 = arith.constant dense<0.000000e+00> : vector<1x8x8xf32>
    %88 = tpu.matmul %81, %84, %cst_17 {dimension_numbers = #tpu.dot_dimension_numbers<[2], [2], [1], [1], [0, 0, 0, 1, 1, 1], [0], [0]>} : vector<1x8x8xbf16>, vector<1x8x8xbf16>, vector<1x8x8xf32> -> vector<1x8x8xf32>
    "tpu.trace_stop"() : () -> ()
    %cst_18 = arith.constant dense<0xFF800000> : vector<1x8xf32>
    %89 = vector.multi_reduction <maximumf>, %88, %cst_18 [2] : vector<1x8x8xf32> to vector<1x8xf32>
    %90 = vector.shape_cast %89 : vector<1x8xf32> to vector<1x8x1xf32>
    %91 = vector.broadcast %90 : vector<1x8x1xf32> to vector<1x8x8xf32>
    %92 = arith.subf %88, %91 : vector<1x8x8xf32>
    %93 = math.exp %92 : vector<1x8x8xf32>
    %cst_19 = arith.constant dense<0.000000e+00> : vector<1x8xf32>
    %94 = vector.multi_reduction <add>, %93, %cst_19 [2] : vector<1x8x8xf32> to vector<1x8xf32>
    %95 = vector.shape_cast %94 : vector<1x8xf32> to vector<1x8x1xf32>
    %96 = vector.broadcast %95 : vector<1x8x1xf32> to vector<1x8x8xf32>
    %97 = arith.divf %93, %96 : vector<1x8x8xf32>
    %98 = arith.truncf %97 : vector<1x8x8xf32> to vector<1x8x8xbf16>
    "tpu.trace_start"() <{level = 10 : i32, message = "bqk,bkd->bqd"}> : () -> ()
    %cst_20 = arith.constant dense<0.000000e+00> : vector<1x8x8xf32>
    %99 = tpu.matmul %98, %87, %cst_20 {dimension_numbers = #tpu.dot_dimension_numbers<[2], [1], [1], [2], [0, 0, 0, 1, 1, 2], [0], [0]>} : vector<1x8x8xbf16>, vector<1x8x8xbf16>, vector<1x8x8xf32> -> vector<1x8x8xf32>
    "tpu.trace_stop"() : () -> ()
    %100 = vector.shape_cast %99 : vector<1x8x8xf32> to vector<8x8xf32>
    %101 = arith.truncf %100 : vector<8x8xf32> to vector<8x8xbf16>
    %102 = tpu.concatenate %32, %55, %78, %101 in 1 : vector<8x8xbf16>, vector<8x8xbf16>, vector<8x8xbf16>, vector<8x8xbf16> -> vector<8x32xbf16>
    %c0_21 = arith.constant 0 : index
    %c0_22 = arith.constant 0 : index
    %103 = vector.load %arg4[%c0_21, %c0_22] : memref<32x32xbf16, #tpu.memory_space<vmem>>, vector<32x32xbf16>
    %cst_23 = arith.constant dense<0.000000e+00> : vector<8x32xf32>
    %104 = tpu.matmul %102, %103, %cst_23 {dimension_numbers = #tpu.dot_dimension_numbers<[1], [0], [0], [1], [0, 0, 1, 1], [], []>} : vector<8x32xbf16>, vector<32x32xbf16>, vector<8x32xf32> -> vector<8x32xf32>
    %c0_24 = arith.constant 0 : index
    %c0_25 = arith.constant 0 : index
    %105 = vector.load %arg5[%c0_24, %c0_25] : memref<1x32xf32, #tpu.memory_space<vmem>>, vector<1x32xf32>
    %106 = vector.broadcast %105 : vector<1x32xf32> to vector<8x32xf32>
    %107 = arith.addf %104, %106 : vector<8x32xf32>
    %108 = arith.addf %0, %107 : vector<8x32xf32>
    %c0_26 = arith.constant 0 : index
    %c0_27 = arith.constant 0 : index
    %109 = vector.load %arg6[%c0_26, %c0_27] : memref<1x32xf32, #tpu.memory_space<vmem>>, vector<1x32xf32>
    %c0_28 = arith.constant 0 : index
    %c0_29 = arith.constant 0 : index
    %110 = vector.load %arg7[%c0_28, %c0_29] : memref<1x32xf32, #tpu.memory_space<vmem>>, vector<1x32xf32>
    %cst_30 = arith.constant dense<0.000000e+00> : vector<8xf32>
    %111 = vector.multi_reduction <add>, %108, %cst_30 [1] : vector<8x32xf32> to vector<8xf32>
    %112 = vector.shape_cast %111 : vector<8xf32> to vector<8x1xf32>
    %cst_31 = arith.constant 3.200000e+01 : f32
    %113 = vector.broadcast %cst_31 : f32 to vector<8x1xf32>
    %114 = arith.divf %112, %113 : vector<8x1xf32>
    %115 = vector.broadcast %114 : vector<8x1xf32> to vector<8x32xf32>
    %116 = arith.subf %108, %115 : vector<8x32xf32>
    %117 = arith.mulf %116, %116 : vector<8x32xf32>
    %cst_32 = arith.constant dense<0.000000e+00> : vector<8xf32>
    %118 = vector.multi_reduction <add>, %117, %cst_32 [1] : vector<8x32xf32> to vector<8xf32>
    %119 = vector.shape_cast %118 : vector<8xf32> to vector<8x1xf32>
    %cst_33 = arith.constant 3.200000e+01 : f32
    %120 = vector.broadcast %cst_33 : f32 to vector<8x1xf32>
    %121 = arith.divf %119, %120 : vector<8x1xf32>
    %cst_34 = arith.constant 9.99999974E-6 : f32
    %122 = vector.broadcast %cst_34 : f32 to vector<8x1xf32>
    %123 = arith.addf %121, %122 : vector<8x1xf32>
    %124 = math.rsqrt %123 : vector<8x1xf32>
    %125 = vector.broadcast %124 : vector<8x1xf32> to vector<8x32xf32>
    %126 = arith.mulf %116, %125 : vector<8x32xf32>
    %127 = vector.broadcast %109 : vector<1x32xf32> to vector<8x32xf32>
    %128 = arith.mulf %126, %127 : vector<8x32xf32>
    %129 = vector.broadcast %110 : vector<1x32xf32> to vector<8x32xf32>
    %130 = arith.addf %128, %129 : vector<8x32xf32>
    %131 = arith.truncf %130 : vector<8x32xf32> to vector<8x32xbf16>
    %c0_35 = arith.constant 0 : index
    %c0_36 = arith.constant 0 : index
    %132 = vector.load %arg8[%c0_35, %c0_36] : memref<32x64xbf16, #tpu.memory_space<vmem>>, vector<32x64xbf16>
    %cst_37 = arith.constant dense<0.000000e+00> : vector<8x64xf32>
    %133 = tpu.matmul %131, %132, %cst_37 {dimension_numbers = #tpu.dot_dimension_numbers<[1], [0], [0], [1], [0, 0, 1, 1], [], []>} : vector<8x32xbf16>, vector<32x64xbf16>, vector<8x64xf32> -> vector<8x64xf32>
    %c0_38 = arith.constant 0 : index
    %c0_39 = arith.constant 0 : index
    %134 = vector.load %arg9[%c0_38, %c0_39] : memref<1x64xf32, #tpu.memory_space<vmem>>, vector<1x64xf32>
    %135 = vector.broadcast %134 : vector<1x64xf32> to vector<8x64xf32>
    %136 = arith.addf %133, %135 : vector<8x64xf32>
    %cst_40 = arith.constant 0.636619746 : f32
    %137 = math.sqrt %cst_40 : f32
    %cst_41 = arith.constant 5.000000e-01 : f32
    %138 = vector.broadcast %cst_41 : f32 to vector<8x64xf32>
    %139 = arith.mulf %138, %136 : vector<8x64xf32>
    %cst_42 = arith.constant 4.471500e-02 : f32
    %140 = vector.broadcast %cst_42 : f32 to vector<8x64xf32>
    %141 = arith.mulf %140, %136 : vector<8x64xf32>
    %142 = arith.mulf %141, %136 : vector<8x64xf32>
    %143 = arith.mulf %142, %136 : vector<8x64xf32>
    %144 = arith.addf %136, %143 : vector<8x64xf32>
    %145 = vector.broadcast %137 : f32 to vector<8x64xf32>
    %146 = arith.mulf %145, %144 : vector<8x64xf32>
    %147 = math.tanh %146 : vector<8x64xf32>
    %cst_43 = arith.constant 1.000000e+00 : f32
    %148 = vector.broadcast %cst_43 : f32 to vector<8x64xf32>
    %149 = arith.addf %148, %147 : vector<8x64xf32>
    %150 = arith.mulf %139, %149 : vector<8x64xf32>
    %151 = arith.truncf %150 : vector<8x64xf32> to vector<8x64xbf16>
    %c0_44 = arith.constant 0 : index
    %c0_45 = arith.constant 0 : index
    %152 = vector.load %arg10[%c0_44, %c0_45] : memref<64x32xbf16, #tpu.memory_space<vmem>>, vector<64x32xbf16>
    %cst_46 = arith.constant dense<0.000000e+00> : vector<8x32xf32>
    %153 = tpu.matmul %151, %152, %cst_46 {dimension_numbers = #tpu.dot_dimension_numbers<[1], [0], [0], [1], [0, 0, 1, 1], [], []>} : vector<8x64xbf16>, vector<64x32xbf16>, vector<8x32xf32> -> vector<8x32xf32>
    %c0_47 = arith.constant 0 : index
    %c0_48 = arith.constant 0 : index
    %154 = vector.load %arg11[%c0_47, %c0_48] : memref<1x32xf32, #tpu.memory_space<vmem>>, vector<1x32xf32>
    %155 = vector.broadcast %154 : vector<1x32xf32> to vector<8x32xf32>
    %156 = arith.addf %153, %155 : vector<8x32xf32>
    %157 = arith.addf %130, %156 : vector<8x32xf32>
    %c0_49 = arith.constant 0 : index
    %c0_50 = arith.constant 0 : index
    %158 = vector.load %arg12[%c0_49, %c0_50] : memref<1x32xf32, #tpu.memory_space<vmem>>, vector<1x32xf32>
    %c0_51 = arith.constant 0 : index
    %c0_52 = arith.constant 0 : index
    %159 = vector.load %arg13[%c0_51, %c0_52] : memref<1x32xf32, #tpu.memory_space<vmem>>, vector<1x32xf32>
    %cst_53 = arith.constant dense<0.000000e+00> : vector<8xf32>
    %160 = vector.multi_reduction <add>, %157, %cst_53 [1] : vector<8x32xf32> to vector<8xf32>
    %161 = vector.shape_cast %160 : vector<8xf32> to vector<8x1xf32>
    %cst_54 = arith.constant 3.200000e+01 : f32
    %162 = vector.broadcast %cst_54 : f32 to vector<8x1xf32>
    %163 = arith.divf %161, %162 : vector<8x1xf32>
    %164 = vector.broadcast %163 : vector<8x1xf32> to vector<8x32xf32>
    %165 = arith.subf %157, %164 : vector<8x32xf32>
    %166 = arith.mulf %165, %165 : vector<8x32xf32>
    %cst_55 = arith.constant dense<0.000000e+00> : vector<8xf32>
    %167 = vector.multi_reduction <add>, %166, %cst_55 [1] : vector<8x32xf32> to vector<8xf32>
    %168 = vector.shape_cast %167 : vector<8xf32> to vector<8x1xf32>
    %cst_56 = arith.constant 3.200000e+01 : f32
    %169 = vector.broadcast %cst_56 : f32 to vector<8x1xf32>
    %170 = arith.divf %168, %169 : vector<8x1xf32>
    %cst_57 = arith.constant 9.99999974E-6 : f32
    %171 = vector.broadcast %cst_57 : f32 to vector<8x1xf32>
    %172 = arith.addf %170, %171 : vector<8x1xf32>
    %173 = math.rsqrt %172 : vector<8x1xf32>
    %174 = vector.broadcast %173 : vector<8x1xf32> to vector<8x32xf32>
    %175 = arith.mulf %165, %174 : vector<8x32xf32>
    %176 = vector.broadcast %158 : vector<1x32xf32> to vector<8x32xf32>
    %177 = arith.mulf %175, %176 : vector<8x32xf32>
    %178 = vector.broadcast %159 : vector<1x32xf32> to vector<8x32xf32>
    %179 = arith.addf %177, %178 : vector<8x32xf32>
    %c0_58 = arith.constant 0 : index
    %c0_59 = arith.constant 0 : index
    %180 = vector.load %arg14[%c0_58, %c0_59] : memref<8x32xf32, #tpu.memory_space<vmem>>, vector<8x32xf32>
    tpu.vector_store %arg14[%c0_58, %c0_59], %179 {strides = array<i32>} : memref<8x32xf32, #tpu.memory_space<vmem>>, vector<8x32xf32>,
    return
  }
  func.func @transform_0(%arg0: i32) -> (i32, i32) {
    %c0_i32 = arith.constant 0 : i32
    %c0_i32_0 = arith.constant 0 : i32
    return %arg0, %c0_i32 : i32, i32
  }
  func.func @transform_1(%arg0: i32) -> (i32, i32) {
    %c0_i32 = arith.constant 0 : i32
    %c0_i32_0 = arith.constant 0 : i32
    %c0_i32_1 = arith.constant 0 : i32
    return %c0_i32, %c0_i32_0 : i32, i32
  }
  func.func @transform_2(%arg0: i32) -> (i32, i32) {
    %c0_i32 = arith.constant 0 : i32
    %c0_i32_0 = arith.constant 0 : i32
    %c0_i32_1 = arith.constant 0 : i32
    return %c0_i32, %c0_i32_0 : i32, i32
  }
  func.func @transform_3(%arg0: i32) -> (i32, i32) {
    %c0_i32 = arith.constant 0 : i32
    %c0_i32_0 = arith.constant 0 : i32
    %c0_i32_1 = arith.constant 0 : i32
    return %c0_i32, %c0_i32_0 : i32, i32
  }
  func.func @transform_4(%arg0: i32) -> (i32, i32) {
    %c0_i32 = arith.constant 0 : i32
    %c0_i32_0 = arith.constant 0 : i32
    %c0_i32_1 = arith.constant 0 : i32
    return %c0_i32, %c0_i32_0 : i32, i32
  }
  func.func @transform_5(%arg0: i32) -> (i32, i32) {
    %c0_i32 = arith.constant 0 : i32
    %c0_i32_0 = arith.constant 0 : i32
    %c0_i32_1 = arith.constant 0 : i32
    return %c0_i32, %c0_i32_0 : i32, i32
  }
  func.func @transform_6(%arg0: i32) -> (i32, i32) {
    %c0_i32 = arith.constant 0 : i32
    %c0_i32_0 = arith.constant 0 : i32
    %c0_i32_1 = arith.constant 0 : i32
    return %c0_i32, %c0_i32_0 : i32, i32
  }
  func.func @transform_7(%arg0: i32) -> (i32, i32) {
    %c0_i32 = arith.constant 0 : i32
    %c0_i32_0 = arith.constant 0 : i32
    %c0_i32_1 = arith.constant 0 : i32
    return %c0_i32, %c0_i32_0 : i32, i32
  }
  func.func @transform_8(%arg0: i32) -> (i32, i32) {
    %c0_i32 = arith.constant 0 : i32
    %c0_i32_0 = arith.constant 0 : i32
    %c0_i32_1 = arith.constant 0 : i32
    return %c0_i32, %c0_i32_0 : i32, i32
  }
  func.func @transform_9(%arg0: i32) -> (i32, i32) {
    %c0_i32 = arith.constant 0 : i32
    %c0_i32_0 = arith.constant 0 : i32
    %c0_i32_1 = arith.constant 0 : i32
    return %c0_i32, %c0_i32_0 : i32, i32
  }
  func.func @transform_10(%arg0: i32) -> (i32, i32) {
    %c0_i32 = arith.constant 0 : i32
    %c0_i32_0 = arith.constant 0 : i32
    %c0_i32_1 = arith.constant 0 : i32
    return %c0_i32, %c0_i32_0 : i32, i32
  }
  func.func @transform_11(%arg0: i32) -> (i32, i32) {
    %c0_i32 = arith.constant 0 : i32
    %c0_i32_0 = arith.constant 0 : i32
    %c0_i32_1 = arith.constant 0 : i32
    return %c0_i32, %c0_i32_0 : i32, i32
  }
  func.func @transform_12(%arg0: i32) -> (i32, i32) {
    %c0_i32 = arith.constant 0 : i32
    %c0_i32_0 = arith.constant 0 : i32
    %c0_i32_1 = arith.constant 0 : i32
    return %c0_i32, %c0_i32_0 : i32, i32
  }
  func.func @transform_13(%arg0: i32) -> (i32, i32) {
    %c0_i32 = arith.constant 0 : i32
    %c0_i32_0 = arith.constant 0 : i32
    return %arg0, %c0_i32 : i32, i32
  }
}

module attributes {stable_mosaic.version = 11 : i64} {
  func.func @encoder_layer_kernel(%arg0: i32, %arg1: memref<8x32xf32, #tpu.memory_space<vmem>>, %arg2: memref<32x96xbf16, #tpu.memory_space<vmem>>, %arg3: memref<1x96xf32, #tpu.memory_space<vmem>>, %arg4: memref<32x32xbf16, #tpu.memory_space<vmem>>, %arg5: memref<1x32xf32, #tpu.memory_space<vmem>>, %arg6: memref<1x32xf32, #tpu.memory_space<vmem>>, %arg7: memref<1x32xf32, #tpu.memory_space<vmem>>, %arg8: memref<32x64xbf16, #tpu.memory_space<vmem>>, %arg9: memref<1x64xf32, #tpu.memory_space<vmem>>, %arg10: memref<64x32xbf16, #tpu.memory_space<vmem>>, %arg11: memref<1x32xf32, #tpu.memory_space<vmem>>, %arg12: memref<1x32xf32, #tpu.memory_space<vmem>>, %arg13: memref<1x32xf32, #tpu.memory_space<vmem>>, %arg14: memref<8x32xf32, #tpu.memory_space<vmem>>) attributes {dimension_semantics = [#tpu.dimension_semantics<parallel>], iteration_bounds = array<i64: 2>, scalar_prefetch = 0 : i64, scratch_operands = 0 : i64, tpu.core_type = #tpu.core_type<tc>, window_params = [{transform_indices = @transform_0, window_bounds = array<i64: 8, 32>}, {pipeline_mode = #tpu.pipeline_mode<synchronous>, transform_indices = @transform_1, window_bounds = array<i64: 32, 96>}, {pipeline_mode = #tpu.pipeline_mode<synchronous>, transform_indices = @transform_2, window_bounds = array<i64: 1, 96>}, {pipeline_mode = #tpu.pipeline_mode<synchronous>, transform_indices = @transform_3, window_bounds = array<i64: 32, 32>}, {pipeline_mode = #tpu.pipeline_mode<synchronous>, transform_indices = @transform_4, window_bounds = array<i64: 1, 32>}, {pipeline_mode = #tpu.pipeline_mode<synchronous>, transform_indices = @transform_5, window_bounds = array<i64: 1, 32>}, {pipeline_mode = #tpu.pipeline_mode<synchronous>, transform_indices = @transform_6, window_bounds = array<i64: 1, 32>}, {pipeline_mode = #tpu.pipeline_mode<synchronous>, transform_indices = @transform_7, window_bounds = array<i64: 32, 64>}, {pipeline_mode = #tpu.pipeline_mode<synchronous>, transform_indices = @transform_8, window_bounds = array<i64: 1, 64>}, {pipeline_mode = #tpu.pipeline_mode<synchronous>, transform_indices = @transform_9, window_bounds = array<i64: 64, 32>}, {pipeline_mode = #tpu.pipeline_mode<synchronous>, transform_indices = @transform_10, window_bounds = array<i64: 1, 32>}, {pipeline_mode = #tpu.pipeline_mode<synchronous>, transform_indices = @transform_11, window_bounds = array<i64: 1, 32>}, {pipeline_mode = #tpu.pipeline_mode<synchronous>, transform_indices = @transform_12, window_bounds = array<i64: 1, 32>}, {transform_indices = @transform_13, window_bounds = array<i64: 8, 32>}]} {
    %c0 = arith.constant 0 : index
    %c0_0 = arith.constant 0 : index
    %0 = vector.load %arg1[%c0, %c0_0] : memref<8x32xf32, #tpu.memory_space<vmem>>, vector<8x32xf32>
    %1 = arith.truncf %0 : vector<8x32xf32> to vector<8x32xbf16>
    %c0_1 = arith.constant 0 : index
    %c0_2 = arith.constant 0 : index
    %2 = vector.load %arg2[%c0_1, %c0_2] : memref<32x96xbf16, #tpu.memory_space<vmem>>, vector<32x96xbf16>
    %cst = arith.constant dense<0.000000e+00> : vector<8x96xf32>
    %3 = tpu.matmul %1, %2, %cst {dimension_numbers = #tpu.dot_dimension_numbers<[1], [0], [0], [1], [0, 0, 1, 1], [], []>} : vector<8x32xbf16>, vector<32x96xbf16>, vector<8x96xf32> -> vector<8x96xf32>
    %c0_3 = arith.constant 0 : index
    %c0_4 = arith.constant 0 : index
    %4 = vector.load %arg3[%c0_3, %c0_4] : memref<1x96xf32, #tpu.memory_space<vmem>>, vector<1x96xf32>
    %5 = vector.broadcast %4 : vector<1x96xf32> to vector<8x96xf32>
    %6 = arith.addf %3, %5 : vector<8x96xf32>
    %7 = vector.extract_strided_slice %6 {offsets = [0, 0], sizes = [8, 32], strides = [1, 1]} : vector<8x96xf32> to vector<8x32xf32>
    %8 = vector.extract_strided_slice %6 {offsets = [0, 32], sizes = [8, 32], strides = [1, 1]} : vector<8x96xf32> to vector<8x32xf32>
    %9 = vector.extract_strided_slice %6 {offsets = [0, 64], sizes = [8, 32], strides = [1, 1]} : vector<8x96xf32> to vector<8x32xf32>
    %10 = vector.extract_strided_slice %7 {offsets = [0, 0], sizes = [8, 8], strides = [1, 1]} : vector<8x32xf32> to vector<8x8xf32>
    %11 = vector.shape_cast %10 : vector<8x8xf32> to vector<1x8x8xf32>
    %12 = arith.truncf %11 : vector<1x8x8xf32> to vector<1x8x8xbf16>
    %13 = vector.extract_strided_slice %8 {offsets = [0, 0], sizes = [8, 8], strides = [1, 1]} : vector<8x32xf32> to vector<8x8xf32>
    %14 = vector.shape_cast %13 : vector<8x8xf32> to vector<1x8x8xf32>
    %15 = arith.truncf %14 : vector<1x8x8xf32> to vector<1x8x8xbf16>
    %16 = vector.extract_strided_slice %9 {offsets = [0, 0], sizes = [8, 8], strides = [1, 1]} : vector<8x32xf32> to vector<8x8xf32>
    %17 = vector.shape_cast %16 : vector<8x8xf32> to vector<1x8x8xf32>
    %18 = arith.truncf %17 : vector<1x8x8xf32> to vector<1x8x8xbf16>
    "tpu.trace_start"() <{level = 10 : i32, message = "bqd,bkd->bqk"}> : () -> ()
    %cst_5 = arith.constant dense<0.000000e+00> : vector<1x8x8xf32>
    %19 = tpu.matmul %12, %15, %cst_5 {dimension_numbers = #tpu.dot_dimension_numbers<[2], [2], [1], [1], [0, 0, 0, 1, 1, 1], [0], [0]>} : vector<1x8x8xbf16>, vector<1x8x8xbf16>, vector<1x8x8xf32> -> vector<1x8x8xf32>
    "tpu.trace_stop"() : () -> ()
    %cst_6 = arith.constant dense<0xFF800000> : vector<1x8xf32>
    %20 = vector.multi_reduction <maximumf>, %19, %cst_6 [2] : vector<1x8x8xf32> to vector<1x8xf32>
    %21 = vector.shape_cast %20 : vector<1x8xf32> to vector<1x8x1xf32>
    %22 = vector.broadcast %21 : vector<1x8x1xf32> to vector<1x8x8xf32>
    %23 = arith.subf %19, %22 : vector<1x8x8xf32>
    %24 = math.exp %23 : vector<1x8x8xf32>
    %cst_7 = arith.constant dense<0.000000e+00> : vector<1x8xf32>
    %25 = vector.multi_reduction <add>, %24, %cst_7 [2] : vector<1x8x8xf32> to vector<1x8xf32>
    %26 = vector.shape_cast %25 : vector<1x8xf32> to vector<1x8x1xf32>
    %27 = vector.broadcast %26 : vector<1x8x1xf32> to vector<1x8x8xf32>
    %28 = arith.divf %24, %27 : vector<1x8x8xf32>
    %29 = arith.truncf %28 : vector<1x8x8xf32> to vector<1x8x8xbf16>
    "tpu.trace_start"() <{level = 10 : i32, message = "bqk,bkd->bqd"}> : () -> ()
    %cst_8 = arith.constant dense<0.000000e+00> : vector<1x8x8xf32>
    %30 = tpu.matmul %29, %18, %cst_8 {dimension_numbers = #tpu.dot_dimension_numbers<[2], [1], [1], [2], [0, 0, 0, 1, 1, 2], [0], [0]>} : vector<1x8x8xbf16>, vector<1x8x8xbf16>, vector<1x8x8xf32> -> vector<1x8x8xf32>
    "tpu.trace_stop"() : () -> ()
    %31 = vector.shape_cast %30 : vector<1x8x8xf32> to vector<8x8xf32>
    %32 = arith.truncf %31 : vector<8x8xf32> to vector<8x8xbf16>
    %33 = vector.extract_strided_slice %7 {offsets = [0, 8], sizes = [8, 8], strides = [1, 1]} : vector<8x32xf32> to vector<8x8xf32>
    %34 = vector.shape_cast %33 : vector<8x8xf32> to vector<1x8x8xf32>
    %35 = arith.truncf %34 : vector<1x8x8xf32> to vector<1x8x8xbf16>
    %36 = vector.extract_strided_slice %8 {offsets = [0, 8], sizes = [8, 8], strides = [1, 1]} : vector<8x32xf32> to vector<8x8xf32>
    %37 = vector.shape_cast %36 : vector<8x8xf32> to vector<1x8x8xf32>
    %38 = arith.truncf %37 : vector<1x8x8xf32> to vector<1x8x8xbf16>
    %39 = vector.extract_strided_slice %9 {offsets = [0, 8], sizes = [8, 8], strides = [1, 1]} : vector<8x32xf32> to vector<8x8xf32>
    %40 = vector.shape_cast %39 : vector<8x8xf32> to vector<1x8x8xf32>
    %41 = arith.truncf %40 : vector<1x8x8xf32> to vector<1x8x8xbf16>
    "tpu.trace_start"() <{level = 10 : i32, message = "bqd,bkd->bqk"}> : () -> ()
    %cst_9 = arith.constant dense<0.000000e+00> : vector<1x8x8xf32>
    %42 = tpu.matmul %35, %38, %cst_9 {dimension_numbers = #tpu.dot_dimension_numbers<[2], [2], [1], [1], [0, 0, 0, 1, 1, 1], [0], [0]>} : vector<1x8x8xbf16>, vector<1x8x8xbf16>, vector<1x8x8xf32> -> vector<1x8x8xf32>
    "tpu.trace_stop"() : () -> ()
    %cst_10 = arith.constant dense<0xFF800000> : vector<1x8xf32>
    %43 = vector.multi_reduction <maximumf>, %42, %cst_10 [2] : vector<1x8x8xf32> to vector<1x8xf32>
    %44 = vector.shape_cast %43 : vector<1x8xf32> to vector<1x8x1xf32>
    %45 = vector.broadcast %44 : vector<1x8x1xf32> to vector<1x8x8xf32>
    %46 = arith.subf %42, %45 : vector<1x8x8xf32>
    %47 = math.exp %46 : vector<1x8x8xf32>
    %cst_11 = arith.constant dense<0.000000e+00> : vector<1x8xf32>
    %48 = vector.multi_reduction <add>, %47, %cst_11 [2] : vector<1x8x8xf32> to vector<1x8xf32>
    %49 = vector.shape_cast %48 : vector<1x8xf32> to vector<1x8x1xf32>
    %50 = vector.broadcast %49 : vector<1x8x1xf32> to vector<1x8x8xf32>
    %51 = arith.divf %47, %50 : vector<1x8x8xf32>
    %52 = arith.truncf %51 : vector<1x8x8xf32> to vector<1x8x8xbf16>
    "tpu.trace_start"() <{level = 10 : i32, message = "bqk,bkd->bqd"}> : () -> ()
    %cst_12 = arith.constant dense<0.000000e+00> : vector<1x8x8xf32>
    %53 = tpu.matmul %52, %41, %cst_12 {dimension_numbers = #tpu.dot_dimension_numbers<[2], [1], [1], [2], [0, 0, 0, 1, 1, 2], [0], [0]>} : vector<1x8x8xbf16>, vector<1x8x8xbf16>, vector<1x8x8xf32> -> vector<1x8x8xf32>
    "tpu.trace_stop"() : () -> ()
    %54 = vector.shape_cast %53 : vector<1x8x8xf32> to vector<8x8xf32>
    %55 = arith.truncf %54 : vector<8x8xf32> to vector<8x8xbf16>
    %56 = vector.extract_strided_slice %7 {offsets = [0, 16], sizes = [8, 8], strides = [1, 1]} : vector<8x32xf32> to vector<8x8xf32>
    %57 = vector.shape_cast %56 : vector<8x8xf32> to vector<1x8x8xf32>
    %58 = arith.truncf %57 : vector<1x8x8xf32> to vector<1x8x8xbf16>
    %59 = vector.extract_strided_slice %8 {offsets = [0, 16], sizes = [8, 8], strides = [1, 1]} : vector<8x32xf32> to vector<8x8xf32>
    %60 = vector.shape_cast %59 : vector<8x8xf32> to vector<1x8x8xf32>
    %61 = arith.truncf %60 : vector<1x8x8xf32> to vector<1x8x8xbf16>
    %62 = vector.extract_strided_slice %9 {offsets = [0, 16], sizes = [8, 8], strides = [1, 1]} : vector<8x32xf32> to vector<8x8xf32>
    %63 = vector.shape_cast %62 : vector<8x8xf32> to vector<1x8x8xf32>
    %64 = arith.truncf %63 : vector<1x8x8xf32> to vector<1x8x8xbf16>
    "tpu.trace_start"() <{level = 10 : i32, message = "bqd,bkd->bqk"}> : () -> ()
    %cst_13 = arith.constant dense<0.000000e+00> : vector<1x8x8xf32>
    %65 = tpu.matmul %58, %61, %cst_13 {dimension_numbers = #tpu.dot_dimension_numbers<[2], [2], [1], [1], [0, 0, 0, 1, 1, 1], [0], [0]>} : vector<1x8x8xbf16>, vector<1x8x8xbf16>, vector<1x8x8xf32> -> vector<1x8x8xf32>
    "tpu.trace_stop"() : () -> ()
    %cst_14 = arith.constant dense<0xFF800000> : vector<1x8xf32>
    %66 = vector.multi_reduction <maximumf>, %65, %cst_14 [2] : vector<1x8x8xf32> to vector<1x8xf32>
    %67 = vector.shape_cast %66 : vector<1x8xf32> to vector<1x8x1xf32>
    %68 = vector.broadcast %67 : vector<1x8x1xf32> to vector<1x8x8xf32>
    %69 = arith.subf %65, %68 : vector<1x8x8xf32>
    %70 = math.exp %69 : vector<1x8x8xf32>
    %cst_15 = arith.constant dense<0.000000e+00> : vector<1x8xf32>
    %71 = vector.multi_reduction <add>, %70, %cst_15 [2] : vector<1x8x8xf32> to vector<1x8xf32>
    %72 = vector.shape_cast %71 : vector<1x8xf32> to vector<1x8x1xf32>
    %73 = vector.broadcast %72 : vector<1x8x1xf32> to vector<1x8x8xf32>
    %74 = arith.divf %70, %73 : vector<1x8x8xf32>
    %75 = arith.truncf %74 : vector<1x8x8xf32> to vector<1x8x8xbf16>
    "tpu.trace_start"() <{level = 10 : i32, message = "bqk,bkd->bqd"}> : () -> ()
    %cst_16 = arith.constant dense<0.000000e+00> : vector<1x8x8xf32>
    %76 = tpu.matmul %75, %64, %cst_16 {dimension_numbers = #tpu.dot_dimension_numbers<[2], [1], [1], [2], [0, 0, 0, 1, 1, 2], [0], [0]>} : vector<1x8x8xbf16>, vector<1x8x8xbf16>, vector<1x8x8xf32> -> vector<1x8x8xf32>
    "tpu.trace_stop"() : () -> ()
    %77 = vector.shape_cast %76 : vector<1x8x8xf32> to vector<8x8xf32>
    %78 = arith.truncf %77 : vector<8x8xf32> to vector<8x8xbf16>
    %79 = vector.extract_strided_slice %7 {offsets = [0, 24], sizes = [8, 8], strides = [1, 1]} : vector<8x32xf32> to vector<8x8xf32>
    %80 = vector.shape_cast %79 : vector<8x8xf32> to vector<1x8x8xf32>
    %81 = arith.truncf %80 : vector<1x8x8xf32> to vector<1x8x8xbf16>
    %82 = vector.extract_strided_slice %8 {offsets = [0, 24], sizes = [8, 8], strides = [1, 1]} : vector<8x32xf32> to vector<8x8xf32>
    %83 = vector.shape_cast %82 : vector<8x8xf32> to vector<1x8x8xf32>
    %84 = arith.truncf %83 : vector<1x8x8xf32> to vector<1x8x8xbf16>
    %85 = vector.extract_strided_slice %9 {offsets = [0, 24], sizes = [8, 8], strides = [1, 1]} : vector<8x32xf32> to vector<8x8xf32>
    %86 = vector.shape_cast %85 : vector<8x8xf32> to vector<1x8x8xf32>
    %87 = arith.truncf %86 : vector<1x8x8xf32> to vector<1x8x8xbf16>
    "tpu.trace_start"() <{level = 10 : i32, message = "bqd,bkd->bqk"}> : () -> ()
    %cst_17 = arith.constant dense<0.000000e+00> : vector<1x8x8xf32>
    %88 = tpu.matmul %81, %84, %cst_17 {dimension_numbers = #tpu.dot_dimension_numbers<[2], [2], [1], [1], [0, 0, 0, 1, 1, 1], [0], [0]>} : vector<1x8x8xbf16>, vector<1x8x8xbf16>, vector<1x8x8xf32> -> vector<1x8x8xf32>
    "tpu.trace_stop"() : () -> ()
    %cst_18 = arith.constant dense<0xFF800000> : vector<1x8xf32>
    %89 = vector.multi_reduction <maximumf>, %88, %cst_18 [2] : vector<1x8x8xf32> to vector<1x8xf32>
    %90 = vector.shape_cast %89 : vector<1x8xf32> to vector<1x8x1xf32>
    %91 = vector.broadcast %90 : vector<1x8x1xf32> to vector<1x8x8xf32>
    %92 = arith.subf %88, %91 : vector<1x8x8xf32>
    %93 = math.exp %92 : vector<1x8x8xf32>
    %cst_19 = arith.constant dense<0.000000e+00> : vector<1x8xf32>
    %94 = vector.multi_reduction <add>, %93, %cst_19 [2] : vector<1x8x8xf32> to vector<1x8xf32>
    %95 = vector.shape_cast %94 : vector<1x8xf32> to vector<1x8x1xf32>
    %96 = vector.broadcast %95 : vector<1x8x1xf32> to vector<1x8x8xf32>
    %97 = arith.divf %93, %96 : vector<1x8x8xf32>
    %98 = arith.truncf %97 : vector<1x8x8xf32> to vector<1x8x8xbf16>
    "tpu.trace_start"() <{level = 10 : i32, message = "bqk,bkd->bqd"}> : () -> ()
    %cst_20 = arith.constant dense<0.000000e+00> : vector<1x8x8xf32>
    %99 = tpu.matmul %98, %87, %cst_20 {dimension_numbers = #tpu.dot_dimension_numbers<[2], [1], [1], [2], [0, 0, 0, 1, 1, 2], [0], [0]>} : vector<1x8x8xbf16>, vector<1x8x8xbf16>, vector<1x8x8xf32> -> vector<1x8x8xf32>
    "tpu.trace_stop"() : () -> ()
    %100 = vector.shape_cast %99 : vector<1x8x8xf32> to vector<8x8xf32>
    %101 = arith.truncf %100 : vector<8x8xf32> to vector<8x8xbf16>
    %102 = tpu.concatenate %32, %55, %78, %101 in 1 : vector<8x8xbf16>, vector<8x8xbf16>, vector<8x8xbf16>, vector<8x8xbf16> -> vector<8x32xbf16>
    %c0_21 = arith.constant 0 : index
    %c0_22 = arith.constant 0 : index
    %103 = vector.load %arg4[%c0_21, %c0_22] : memref<32x32xbf16, #tpu.memory_space<vmem>>, vector<32x32xbf16>
    %cst_23 = arith.constant dense<0.000000e+00> : vector<8x32xf32>
    %104 = tpu.matmul %102, %103, %cst_23 {dimension_numbers = #tpu.dot_dimension_numbers<[1], [0], [0], [1], [0, 0, 1, 1], [], []>} : vector<8x32xbf16>, vector<32x32xbf16>, vector<8x32xf32> -> vector<8x32xf32>
    %c0_24 = arith.constant 0 : index
    %c0_25 = arith.constant 0 : index
    %105 = vector.load %arg5[%c0_24, %c0_25] : memref<1x32xf32, #tpu.memory_space<vmem>>, vector<1x32xf32>
    %106 = vector.broadcast %105 : vector<1x32xf32> to vector<8x32xf32>
    %107 = arith.addf %104, %106 : vector<8x32xf32>
    %108 = arith.addf %0, %107 : vector<8x32xf32>
    %c0_26 = arith.constant 0 : index
    %c0_27 = arith.constant 0 : index
    %109 = vector.load %arg6[%c0_26, %c0_27] : memref<1x32xf32, #tpu.memory_space<vmem>>, vector<1x32xf32>
    %c0_28 = arith.constant 0 : index
    %c0_29 = arith.constant 0 : index
    %110 = vector.load %arg7[%c0_28, %c0_29] : memref<1x32xf32, #tpu.memory_space<vmem>>, vector<1x32xf32>
    %cst_30 = arith.constant dense<0.000000e+00> : vector<8xf32>
    %111 = vector.multi_reduction <add>, %108, %cst_30 [1] : vector<8x32xf32> to vector<8xf32>
    %112 = vector.shape_cast %111 : vector<8xf32> to vector<8x1xf32>
    %cst_31 = arith.constant 3.200000e+01 : f32
    %113 = vector.broadcast %cst_31 : f32 to vector<8x1xf32>
    %114 = arith.divf %112, %113 : vector<8x1xf32>
    %115 = vector.broadcast %114 : vector<8x1xf32> to vector<8x32xf32>
    %116 = arith.subf %108, %115 : vector<8x32xf32>
    %117 = arith.mulf %116, %116 : vector<8x32xf32>
    %cst_32 = arith.constant dense<0.000000e+00> : vector<8xf32>
    %118 = vector.multi_reduction <add>, %117, %cst_32 [1] : vector<8x32xf32> to vector<8xf32>
    %119 = vector.shape_cast %118 : vector<8xf32> to vector<8x1xf32>
    %cst_33 = arith.constant 3.200000e+01 : f32
    %120 = vector.broadcast %cst_33 : f32 to vector<8x1xf32>
    %121 = arith.divf %119, %120 : vector<8x1xf32>
    %cst_34 = arith.constant 9.99999974E-6 : f32
    %122 = vector.broadcast %cst_34 : f32 to vector<8x1xf32>
    %123 = arith.addf %121, %122 : vector<8x1xf32>
    %124 = math.rsqrt %123 : vector<8x1xf32>
    %125 = vector.broadcast %124 : vector<8x1xf32> to vector<8x32xf32>
    %126 = arith.mulf %116, %125 : vector<8x32xf32>
    %127 = vector.broadcast %109 : vector<1x32xf32> to vector<8x32xf32>
    %128 = arith.mulf %126, %127 : vector<8x32xf32>
    %129 = vector.broadcast %110 : vector<1x32xf32> to vector<8x32xf32>
    %130 = arith.addf %128, %129 : vector<8x32xf32>
    %131 = arith.truncf %130 : vector<8x32xf32> to vector<8x32xbf16>
    %c0_35 = arith.constant 0 : index
    %c0_36 = arith.constant 0 : index
    %132 = vector.load %arg8[%c0_35, %c0_36] : memref<32x64xbf16, #tpu.memory_space<vmem>>, vector<32x64xbf16>
    %cst_37 = arith.constant dense<0.000000e+00> : vector<8x64xf32>
    %133 = tpu.matmul %131, %132, %cst_37 {dimension_numbers = #tpu.dot_dimension_numbers<[1], [0], [0], [1], [0, 0, 1, 1], [], []>} : vector<8x32xbf16>, vector<32x64xbf16>, vector<8x64xf32> -> vector<8x64xf32>
    %c0_38 = arith.constant 0 : index
    %c0_39 = arith.constant 0 : index
    %134 = vector.load %arg9[%c0_38, %c0_39] : memref<1x64xf32, #tpu.memory_space<vmem>>, vector<1x64xf32>
    %135 = vector.broadcast %134 : vector<1x64xf32> to vector<8x64xf32>
    %136 = arith.addf %133, %135 : vector<8x64xf32>
    %cst_40 = arith.constant 0.636619746 : f32
    %137 = math.sqrt %cst_40 : f32
    %cst_41 = arith.constant 5.000000e-01 : f32
    %138 = vector.broadcast %cst_41 : f32 to vector<8x64xf32>
    %139 = arith.mulf %138, %136 : vector<8x64xf32>
    %cst_42 = arith.constant 4.471500e-02 : f32
    %140 = vector.broadcast %cst_42 : f32 to vector<8x64xf32>
    %141 = arith.mulf %140, %136 : vector<8x64xf32>
    %142 = arith.mulf %141, %136 : vector<8x64xf32>
    %143 = arith.mulf %142, %136 : vector<8x64xf32>
    %144 = arith.addf %136, %143 : vector<8x64xf32>
    %145 = vector.broadcast %137 : f32 to vector<8x64xf32>
    %146 = arith.mulf %145, %144 : vector<8x64xf32>
    %147 = math.tanh %146 : vector<8x64xf32>
    %cst_43 = arith.constant 1.000000e+00 : f32
    %148 = vector.broadcast %cst_43 : f32 to vector<8x64xf32>
    %149 = arith.addf %148, %147 : vector<8x64xf32>
    %150 = arith.mulf %139, %149 : vector<8x64xf32>
    %151 = arith.truncf %150 : vector<8x64xf32> to vector<8x64xbf16>
    %c0_44 = arith.constant 0 : index
    %c0_45 = arith.constant 0 : index
    %152 = vector.load %arg10[%c0_44, %c0_45] : memref<64x32xbf16, #tpu.memory_space<vmem>>, vector<64x32xbf16>
    %cst_46 = arith.constant dense<0.000000e+00> : vector<8x32xf32>
    %153 = tpu.matmul %151, %152, %cst_46 {dimension_numbers = #tpu.dot_dimension_numbers<[1], [0], [0], [1], [0, 0, 1, 1], [], []>} : vector<8x64xbf16>, vector<64x32xbf16>, vector<8x32xf32> -> vector<8x32xf32>
    %c0_47 = arith.constant 0 : index
    %c0_48 = arith.constant 0 : index
    %154 = vector.load %arg11[%c0_47, %c0_48] : memref<1x32xf32, #tpu.memory_space<vmem>>, vector<1x32xf32>
    %155 = vector.broadcast %154 : vector<1x32xf32> to vector<8x32xf32>
    %156 = arith.addf %153, %155 : vector<8x32xf32>
    %157 = arith.addf %130, %156 : vector<8x32xf32>
    %c0_49 = arith.constant 0 : index
    %c0_50 = arith.constant 0 : index
    %158 = vector.load %arg12[%c0_49, %c0_50] : memref<1x32xf32, #tpu.memory_space<vmem>>, vector<1x32xf32>
    %c0_51 = arith.constant 0 : index
    %c0_52 = arith.constant 0 : index
    %159 = vector.load %arg13[%c0_51, %c0_52] : memref<1x32xf32, #tpu.memory_space<vmem>>, vector<1x32xf32>
    %cst_53 = arith.constant dense<0.000000e+00> : vector<8xf32>
    %160 = vector.multi_reduction <add>, %157, %cst_53 [1] : vector<8x32xf32> to vector<8xf32>
    %161 = vector.shape_cast %160 : vector<8xf32> to vector<8x1xf32>
    %cst_54 = arith.constant 3.200000e+01 : f32
    %162 = vector.broadcast %cst_54 : f32 to vector<8x1xf32>
    %163 = arith.divf %161, %162 : vector<8x1xf32>
    %164 = vector.broadcast %163 : vector<8x1xf32> to vector<8x32xf32>
    %165 = arith.subf %157, %164 : vector<8x32xf32>
    %166 = arith.mulf %165, %165 : vector<8x32xf32>
    %cst_55 = arith.constant dense<0.000000e+00> : vector<8xf32>
    %167 = vector.multi_reduction <add>, %166, %cst_55 [1] : vector<8x32xf32> to vector<8xf32>
    %168 = vector.shape_cast %167 : vector<8xf32> to vector<8x1xf32>
    %cst_56 = arith.constant 3.200000e+01 : f32
    %169 = vector.broadcast %cst_56 : f32 to vector<8x1xf32>
    %170 = arith.divf %168, %169 : vector<8x1xf32>
    %cst_57 = arith.constant 9.99999974E-6 : f32
    %171 = vector.broadcast %cst_57 : f32 to vector<8x1xf32>
    %172 = arith.addf %170, %171 : vector<8x1xf32>
    %173 = math.rsqrt %172 : vector<8x1xf32>
    %174 = vector.broadcast %173 : vector<8x1xf32> to vector<8x32xf32>
    %175 = arith.mulf %165, %174 : vector<8x32xf32>
    %176 = vector.broadcast %158 : vector<1x32xf32> to vector<8x32xf32>
    %177 = arith.mulf %175, %176 : vector<8x32xf32>
    %178 = vector.broadcast %159 : vector<1x32xf32> to vector<8x32xf32>
    %179 = arith.addf %177, %178 : vector<8x32xf32>
    %c0_58 = arith.constant 0 : index
    %c0_59 = arith.constant 0 : index
    %180 = vector.load %arg14[%c0_58, %c0_59] : memref<8x32xf32, #tpu.memory_space<vmem>>, vector<8x32xf32>
    tpu.vector_store %arg14[%c0_58, %c0_59], %179 {strides = array<i32>} : memref<8x32xf32, #tpu.memory_space<vmem>>, vector<8x32xf32>,
    return
  }
  func.func @transform_0(%arg0: i32) -> (i32, i32) {
    %c0_i32 = arith.constant 0 : i32
    %c0_i32_0 = arith.constant 0 : i32
    return %arg0, %c0_i32 : i32, i32
  }
  func.func @transform_1(%arg0: i32) -> (i32, i32) {
    %c0_i32 = arith.constant 0 : i32
    %c0_i32_0 = arith.constant 0 : i32
    %c0_i32_1 = arith.constant 0 : i32
    return %c0_i32, %c0_i32_0 : i32, i32
  }
  func.func @transform_2(%arg0: i32) -> (i32, i32) {
    %c0_i32 = arith.constant 0 : i32
    %c0_i32_0 = arith.constant 0 : i32
    %c0_i32_1 = arith.constant 0 : i32
    return %c0_i32, %c0_i32_0 : i32, i32
  }
  func.func @transform_3(%arg0: i32) -> (i32, i32) {
    %c0_i32 = arith.constant 0 : i32
    %c0_i32_0 = arith.constant 0 : i32
    %c0_i32_1 = arith.constant 0 : i32
    return %c0_i32, %c0_i32_0 : i32, i32
  }
  func.func @transform_4(%arg0: i32) -> (i32, i32) {
    %c0_i32 = arith.constant 0 : i32
    %c0_i32_0 = arith.constant 0 : i32
    %c0_i32_1 = arith.constant 0 : i32
    return %c0_i32, %c0_i32_0 : i32, i32
  }
  func.func @transform_5(%arg0: i32) -> (i32, i32) {
    %c0_i32 = arith.constant 0 : i32
    %c0_i32_0 = arith.constant 0 : i32
    %c0_i32_1 = arith.constant 0 : i32
    return %c0_i32, %c0_i32_0 : i32, i32
  }
  func.func @transform_6(%arg0: i32) -> (i32, i32) {
    %c0_i32 = arith.constant 0 : i32
    %c0_i32_0 = arith.constant 0 : i32
    %c0_i32_1 = arith.constant 0 : i32
    return %c0_i32, %c0_i32_0 : i32, i32
  }
  func.func @transform_7(%arg0: i32) -> (i32, i32) {
    %c0_i32 = arith.constant 0 : i32
    %c0_i32_0 = arith.constant 0 : i32
    %c0_i32_1 = arith.constant 0 : i32
    return %c0_i32, %c0_i32_0 : i32, i32
  }
  func.func @transform_8(%arg0: i32) -> (i32, i32) {
    %c0_i32 = arith.constant 0 : i32
    %c0_i32_0 = arith.constant 0 : i32
    %c0_i32_1 = arith.constant 0 : i32
    return %c0_i32, %c0_i32_0 : i32, i32
  }
  func.func @transform_9(%arg0: i32) -> (i32, i32) {
    %c0_i32 = arith.constant 0 : i32
    %c0_i32_0 = arith.constant 0 : i32
    %c0_i32_1 = arith.constant 0 : i32
    return %c0_i32, %c0_i32_0 : i32, i32
  }
  func.func @transform_10(%arg0: i32) -> (i32, i32) {
    %c0_i32 = arith.constant 0 : i32
    %c0_i32_0 = arith.constant 0 : i32
    %c0_i32_1 = arith.constant 0 : i32
    return %c0_i32, %c0_i32_0 : i32, i32
  }
  func.func @transform_11(%arg0: i32) -> (i32, i32) {
    %c0_i32 = arith.constant 0 : i32
    %c0_i32_0 = arith.constant 0 : i32
    %c0_i32_1 = arith.constant 0 : i32
    return %c0_i32, %c0_i32_0 : i32, i32
  }
  func.func @transform_12(%arg0: i32) -> (i32, i32) {
    %c0_i32 = arith.constant 0 : i32
    %c0_i32_0 = arith.constant 0 : i32
    %c0_i32_1 = arith.constant 0 : i32
    return %c0_i32, %c0_i32_0 : i32, i32
  }
  func.func @transform_13(%arg0: i32) -> (i32, i32) {
    %c0_i32 = arith.constant 0 : i32
    %c0_i32_0 = arith.constant 0 : i32
    return %arg0, %c0_i32 : i32, i32
  }
}

</mosaic_0001>

<bundles_post_ra>
// kernel: tpu_custom_call.1
= control target key start
LH: loop header
LB: loop body
LE: loop exit
PB: predicated region body
PF: predicated region fallthrough
CT: control target
= control target key end

     0   :  { %s2076_s0 = inlined_call_operand.vmem [shape: f32[16,32], index: 0, kind: input, shape index: {}]   ;;  %s2077_s1 = inlined_call_operand.vmem [shape: bf16[32,96], index: 1, kind: input, shape index: {}]   ;;  %s2078_s2 = inlined_call_operand.vmem [shape: f32[1,96], index: 2, kind: input, shape index: {}]   ;;  %s2079_s3 = inlined_call_operand.vmem [shape: bf16[32,32], index: 3, kind: input, shape index: {}]   ;;  %s2080_s4 = inlined_call_operand.vmem [shape: f32[1,32], index: 4, kind: input, shape index: {}]   ;;  %s2081_s5 = inlined_call_operand.vmem [shape: f32[1,32], index: 5, kind: input, shape index: {}]   ;;  %s2082_s6 = inlined_call_operand.vmem [shape: f32[1,32], index: 6, kind: input, shape index: {}]   ;;  %s2083_s7 = inlined_call_operand.hbm [shape: bf16[32,64], index: 7, kind: input, shape index: {}]   ;;  %s2084_s8 = inlined_call_operand.vmem [shape: f32[1,64], index: 8, kind: input, shape index: {}]   ;;  %s2085_s9 = inlined_call_operand.vmem [shape: bf16[64,32], index: 9, kind: input, shape index: {}]   ;;  %s2086_s10 = inlined_call_operand.vmem [shape: f32[1,32], index: 10, kind: input, shape index: {}]   ;;  %s2087_s11 = inlined_call_operand.vmem [shape: f32[1,32], index: 11, kind: input, shape index: {}]   ;;  %s2088_s12 = inlined_call_operand.vmem [shape: f32[1,32], index: 12, kind: input, shape index: {}]   ;;  %s2089_s13 = inlined_call_operand.hbm [shape: f32[16,32], index: 13, kind: output, shape index: {}]  }
   0x1   :  { %2096 = sst [smem:[#allocation11_spill]] %s2076_s0 }
   0x2   :  { %18 = vsyncpa [#allocation3], 0 }
   0x3   :  { %19 = vsyncpa [#allocation4], 0 }
   0x4   :  { %21 = vsyncpa [#allocation4 + $0x1], 0  ;;  %s1799_s25 = smov 0   ;;  %s1801_s26 = smov 0  }
   0x5   :  { %s1803_s27 = smov 0   ;;  %s1805_s28 = smov 0  }
   0x6 LB: > { %2097 = sst [smem:[#allocation8_spill]] %s1703_s27  ;;  %s1820_s29 = sadd.s32 4294967295, %s1707_s28   ;;  %s1707_s28 = sphi %s1805_s28, %s2110_s28   ;;  %s1703_s27 = sphi %s1803_s27, %s2112_s27   ;;  %s1699_s26 = sphi %s1801_s26, %s2114_s26   ;;  %s1695_s25 = sphi %s1799_s25, %s2113_s25  }
   0x7   : > { %s1357_s30 = sadd.s32 4294967294, %s1707_s28   ;;  %s1824_s14 = sadd.s32 1, %s1707_s28  }
   0x8   : > { %2098 = sst [smem:[#allocation9_spill]] %s1824_s14  ;;  %s312_s15 = sadd.s32 1, %s1703_s27 }
   0x9   : > { %s309_s16 = ssub.s32 %s1707_s28, %s1824_s14  ;;  %p322_p0 = scmp.ne.s32.totalorder %s1703_s27, %s1699_s26 }
   0xa   : > { %p310_p1 = scmp.eq.s32.totalorder %s309_s16, 0  ;;  %p323_p2 = scmp.eq.s32.totalorder %s1820_s29, 1 }
   0xb   : > { %p328_p3 = scmp.ne.s32.totalorder %s1699_s26, %s1695_s25  ;;  %p329_p4 = scmp.eq.s32.totalorder %s1357_s30, 1 }
   0xc   : > { %s1835_s17 = scalar_select %p310_p1, %s1703_s27, %s312_s15  }
   0xd   : > { %p1837_p5 = por %p323_p2, %p322_p0  ;;  %p1841_p6 = por %p329_p4, %p328_p3 }
   0xe   : > { %2099 = sst [smem:[#allocation10_spill]] %s1835_s17  ;;  %p1358_p7 = scmp.ge.s32.totalorder %s1707_s28, 1 }
   0xf   : > { %s2100_s18 = scalar_select %p1837_p5, 1, 0 }
  0x10   : > { %s2101_s19 = scalar_select %p1841_p6, 1, 0 }
  0x11   : > { %p336_p8 = scmp.lt.s32.totalorder %s1707_s28, 3  ;;  %p2093_p9 = scmp.eq.s32.totalorder %s1820_s29, 0 }
  0x12   : > { %s1709_s21 = smov [#allocation2]   ;;  %s1613_s15 = scalar_lea.hbm %s2083_s7, 256 }
  0x13   : > { %p1848_p10 = pnand %p1358_p7, %p336_p8  ;;  %s366_s22 = sshll.u32 %s1709_s21, 4  ;;  %s367_s22 = int_to_ptr.vmem [resolvable:$true] %s366_s22 }
  0x14   : > { %p1614_p13 = scmp.ne.s32.totalorder %s2083_s7, %s1613_s15  ;;  %p1620_p3 = scmp.lt.u32.totalorder %s1613_s15, %s2083_s7 }
  0x15   : > { %s2102_s20 = scalar_select %p1848_p10, 1, 0 }
  0x16   : > { %p1519_p11 = pneg %p1848_p10 }
  0x18   : > { %p1856_p12 = pnand %p2093_p9, %p1519_p11 }
  0x1a   : > { %p1615_p0 = pneg %p1856_p12 }
  0x1c   : > { %p1616_p1 = pnand %p1615_p0, %p1614_p13 }
  0x1e   : > { %p1617_p2 = pneg %p1616_p1 }
  0x20   : > { %p1622_p4 = pnand %p1620_p3, %p1617_p2 }
  0x22   : > { %1625 = shalt.err (!%p1622_p4)
}
  0x23   : > { %s1626_s14 = scalar_lea.vmem %s367_s22, 256  ;;  %p1634_p9 = scmp.lt.s32.totalorder %s367_s22, %s367_s22 }
  0x24   : > { %p1627_p7 = scmp.ne.s32.totalorder %s367_s22, %s1626_s14  ;;  %p1635_p6 = scmp.lt.s32.totalorder %s1626_s14, %s1626_s14 }
  0x26   : > { %p1629_p8 = pnand %p1627_p7, %p1615_p0  ;;  %p1636_p5 = por %p1635_p6, %p1634_p9 }
  0x28   : > { %p1630_p11 = pneg %p1629_p8 }
  0x2a   : > { %p1637_p10 = pnand %p1636_p5, %p1630_p11 }
  0x2c   : > { %1640 = shalt.err (!%p1637_p10)
}
  0x2d   : > { %s1710_s17 = smov 64   ;;  %s1711_s24 = smov 4  }
  0x2e   : > { %1522 = dma.hbm_to_vmem [thread:$0]  (!%p1856_p12), %s2083_s7, 256, %s367_s22, [#allocation3], %s1710_s17, %s1710_s17, %s1711_s24  }
  0x2f   : > { %p2104_p13 = scmp.ne.s32.totalorder %s2102_s20, 0 }
  0x30   : > { %p2105_p1 = scmp.eq.s32.totalorder (!%p2104_p13), %s1820_s29, 0 }
  0x31   : > { %404 = sbr.rel (%p2104_p13) target bundleno = 2641 (0xa51), region = 72 }
  0x38   : > { %1686 = dma.done.wait (%p2105_p1), [#allocation3], 256   ;;  %p2106_p0 = pmov %p2105_p1 }
  0x39   : > { %p447_p5 = scmp.lt.s32.totalorder %s1820_s29, 1  ;;  %v1712_v0 = vmov 0.0   ;;  %vm1713_vm0 = vmmov 0   ;;  %s2107_s0 = sld [smem:[#allocation11_spill]]  ;;  %v1581_v1 = vld [vmem:[%s2077_s1] sm:$0xff]   ;;  %v1582_v2 = vld [vmem:[%s2077_s1 + $0x8] sm:$0xff]  }
  0x3a   : > { %1688 = vsyncadd (%p2106_p0), [#allocation3], 4294967040  ;;  %1429 = vmatprep.subr.bf16.mxu0 %v1712_v0  ;;  %1433 = vmatprep.mubr.msk.bf16.mxu0 %vm1713_vm0, %v1712_v0  ;;  %vm477_vm1 = vcmask 261120   ;;  %v1365_v5 = vld [vmem:[%s2078_s2] ss:$0 sm:$0xff]  ;;  %s1716_s20 = smov 80  }
  0x3b   : > { %s448_s27 = scalar_select %p447_p5, %s1820_s29, 1  ;;  %1437 = vmatprep.subr.bf16.mxu1 %v1712_v0  ;;  %1439 = vmatprep.mubr.msk.bf16.mxu1 %vm1713_vm0, %v1712_v0  ;;  %vm525_vm2 = vcmask 64512   ;;  %vm589_vm3 = vcmask 1043456   ;;  %vm979_vm4 = vcmask 130048   ;;  %vm982_vm5 = vcmask 195584  }
  0x3c   : > { %1430 = vmatpush3.bf16.msra.mxu0 %v1581_v1  ;;  %s1717_s22 = smov 88   ;;  %s1719_s15 = smov 112   ;;  %vm1197_vm6 = vcmask 523264  }
  0x3d   : > { %s1364_s14 = sshll.u32 %s448_s27, 3  ;;  %1431 = vmatprep.subr.bf16.mxu0 %v1712_v0  ;;  %s1714_s27 = smov 120  }
  0x3e   : > { %s1720_s21 = smov 104   ;;  %s1721_s17 = smov 56  }
  0x3f   : > { %s450_s23 = scalar_lea.vmem %s2107_s0, %s1364_s14  ;;  %s1715_s14 = smov 96  }
  0x40   : > { %v1899_v3 = vld [vmem:[%s450_s23] sm:$0xff]  ;;  %1432 = vmatpush3.bf16.msra.mxu0 %v1582_v2  ;;  %s1718_s23 = smov 72   ;;  %s1722_s24 = smov 64  }
  0x41   : > { %v453_v4 = vpack.c.bf16 %v1899_v3, %v1899_v3  ;;  %1443 = vmatprep.subr.bf16.mxu0 %v1712_v0  ;;  %s1723_s30 = smov 40   ;;  %s1724_s16 = smov 48  }
  0x42   : > { %p2108_p9 = scmp.ne.s32.totalorder %s2100_s18, 0 }
  0x43   : > { %1434 = vmatmul.mubr.msk.bf16.vlgmr.msra.gmra.mrb[0].mxu0 %vm477_vm1, %v453_v4 }
  0x44   : > { %1445 = vmatprep.mubr.msk.bf16.mxu0 %vm1713_vm0, %v1712_v0 }
 0x116   : > { %v515_v6 = vpop.f32.mrb[0].mxu0 }
 0x117   : > { %v516_v7 = vadd.f32 %v1365_v5, %v515_v6  ;;  %v1435_v8 = vpop.f32.mrb[1].mxu0 }
 0x118   : > { %v518_v9 = vpop.f32.mrb[2].mxu0 }
 0x119   : > { %v1911_v10 = vpack.c.bf16 %v516_v7, %v516_v7  ;;  %v1436_v11 = vpop.f32.mrb[3].mxu0 }
 0x11b   : > { %634 = vrot.lane.b32.xlu1 %v1911_v10, %s1714_s27  ;;  %523 = vrot.lane.b32.xlu0 %v1911_v10, %s1715_s14  ;;  %s1725_s27 = smov 8  }
 0x11f   : > { %747 = vrot.lane.b32.xlu1 %v1911_v10, %s1716_s20  ;;  %636 = vrot.lane.b32.xlu0 %v1911_v10, %s1717_s22  ;;  %s444_s22 = sand.u32 1, %s1699_s26  }
 0x123   : > { %858 = vrot.lane.b32.xlu1 %v1911_v10, %s1718_s23  ;;  %745 = vrot.lane.b32.xlu0 %v1911_v10, %s1719_s15  ;;  %s1726_s15 = smov 16   ;;  %s1363_s23 = sshll.u32 %s444_s22, 3 }
 0x127   : > { %856 = vrot.lane.b32.xlu0 %v1911_v10, %s1720_s21  ;;  %s1727_s21 = smov 24  }
 0x18d   : > { %v524_v12 = vpop.permute.xlu0 %523  ;;  %v635_v15 = vpop.permute.xlu1 %634 }
 0x18e   : > { %v530_v13 = vsel %vm525_vm2, %v524_v12, 0 }
 0x18f   : > { %1438 = vmatpush3.bf16.xpose.msra.mxu1 %v530_v13 }
 0x190   : > { %1449 = vmatprep.subr.bf16.mxu1 %v1712_v0 }
 0x191   : > { %v637_v14 = vpop.permute.xlu0 %636  ;;  %v748_v17 = vpop.permute.xlu1 %747 }
 0x192   : > { %v642_v16 = vsel %vm525_vm2, %v637_v14, 0  ;;  %v753_v18 = vsel %vm525_vm2, %v748_v17, 0 }
 0x195   : > { %v859_v19 = vpop.permute.xlu1 %858  ;;  %v746_v20 = vpop.permute.xlu0 %745 }
 0x196   : > { %1440 = vmatmul.mubr.msk.bf16.vlgmr.msra.gmra.mrb[0].mxu1 %vm525_vm2, %v1911_v10  ;;  %v864_v21 = vsel %vm525_vm2, %v859_v19, 0 }
 0x197   : > { %1450 = vmatpush3.bf16.xpose.msra.mxu1 %v642_v16  ;;  %1451 = vmatprep.mubr.msk.bf16.mxu1 %vm1713_vm0, %v1712_v0 }
 0x198   : > { %1461 = vmatprep.subr.bf16.mxu1 %v1712_v0 }
 0x199   : > { %v857_v22 = vpop.permute.xlu0 %856 }
 0x19e   : > { %1452 = vmatmul.mubr.msk.bf16.vlgmr.msra.gmra.mrb[4].mxu1 %vm525_vm2, %v635_v15 }
 0x19f   : > { %1462 = vmatpush3.bf16.xpose.msra.mxu1 %v753_v18  ;;  %1463 = vmatprep.mubr.msk.bf16.mxu1 %vm1713_vm0, %v1712_v0 }
 0x1a0   : > { %1473 = vmatprep.subr.bf16.mxu1 %v1712_v0 }
 0x1a6   : > { %1464 = vmatmul.mubr.msk.bf16.vlgmr.msra.gmra.mrb[8].mxu1 %vm525_vm2, %v746_v20 }
 0x1a7   : > { %1474 = vmatpush3.bf16.xpose.msra.mxu1 %v864_v21  ;;  %1475 = vmatprep.mubr.msk.bf16.mxu1 %vm1713_vm0, %v1712_v0 }
 0x1a8   : > { %1485 = vmatprep.subr.bf16.mxu1 %v1712_v0 }
 0x1ae   : > { %1476 = vmatmul.mubr.msk.bf16.vlgmr.msra.gmra.mrb[12].mxu1 %vm525_vm2, %v857_v22 }
 0x1af   : > { %1489 = vmatprep.mubr.msk.bf16.mxu1 %vm1713_vm0, %v1712_v0 }
 0x269   : > { %v566_v23 = vpop.f32.mrb[0].mxu1 }
 0x26a   : > { %v1441_v24 = vpop.f32.mrb[1].mxu1  ;;  %v572_v25 = vsel %vm525_vm2, %v566_v23, -inf }
 0x26b   : > { %573 = vmax.xlane.f32.xlu1 %v572_v25  ;;  %v569_v26 = vpop.f32.mrb[2].mxu1 }
 0x26c   : > { %v1442_v27 = vpop.f32.mrb[3].mxu1 }
 0x271   : > { %v678_v28 = vpop.f32.mrb[4].mxu1 }
 0x272   : > { %v1453_v29 = vpop.f32.mrb[5].mxu1  ;;  %v684_v30 = vsel %vm525_vm2, %v678_v28, -inf }
 0x273   : > { %685 = vmax.xlane.f32.xlu0 %v684_v30  ;;  %v681_v31 = vpop.f32.mrb[6].mxu1 }
 0x274   : > { %v1454_v32 = vpop.f32.mrb[7].mxu1 }
 0x279   : > { %v789_v33 = vpop.f32.mrb[8].mxu1 }
 0x27a   : > { %v1465_v34 = vpop.f32.mrb[9].mxu1  ;;  %v795_v35 = vsel %vm525_vm2, %v789_v33, -inf }
 0x27b   : > { %796 = vmax.xlane.f32.xlu0 %v795_v35  ;;  %v792_v36 = vpop.f32.mrb[10].mxu1  ;;  %v1583_v34 = vld [vmem:[%s2079_s3] sm:$0xff]   ;;  %v1584_v35 = vld [vmem:[%s2079_s3 + $0x8] sm:$0xff]  }
 0x27c   : > { %v1466_v37 = vpop.f32.mrb[11].mxu1  ;;  %1486 = vmatpush3.bf16.msra.mxu1 %v1583_v34  ;;  %v1387_v34 = vld [vmem:[%s2086_s10] ss:$0 sm:$0xff] }
 0x27d   : > { %1487 = vmatprep.subr.bf16.mxu1 %v1712_v0 }
 0x280   : > { %1488 = vmatpush3.bf16.msra.mxu1 %v1584_v35 }
 0x281   : > { %v900_v38 = vpop.f32.mrb[12].mxu1  ;;  %1501 = vmatprep.subr.bf16.mxu1 %v1712_v0 }
 0x282   : > { %v1477_v39 = vpop.f32.mrb[13].mxu1  ;;  %v906_v40 = vsel %vm525_vm2, %v900_v38, -inf }
 0x283   : > { %907 = vmax.xlane.f32.xlu1 %v906_v40  ;;  %v903_v41 = vpop.f32.mrb[14].mxu1 }
 0x284   : > { %v1478_v42 = vpop.f32.mrb[15].mxu1 }
 0x2f8   : > { %v574_v43 = vpop.xlane.xlu1 %573 }
 0x2f9   : > { %v575_v44 = vsub.f32 %v566_v23, %v574_v43 }
 0x2fb   : > { %v576_v45 = vmul.f32 1.442695, %v575_v44 }
 0x2fd   : > { %1591 = vpow2.f32 %v576_v45 }
 0x300   : > { %v686_v46 = vpop.xlane.xlu0 %685 }
 0x301   : > { %v687_v47 = vsub.f32 %v678_v28, %v686_v46 }
 0x303   : > { %v688_v48 = vmul.f32 1.442695, %v687_v47 }
 0x305   : > { %1593 = vpow2.f32 %v688_v48 }
 0x307   : > { %v1592_v49 = vpop.eup %1591 }
 0x308   : > { %v797_v50 = vpop.xlane.xlu0 %796  ;;  %v578_v51 = vsel %vm525_vm2, %v1592_v49, 0.0 }
 0x309   : > { %v798_v52 = vsub.f32 %v789_v33, %v797_v50  ;;  %579 = vadd.xlane.f32.xlu0 %v578_v51 }
 0x30b   : > { %v799_v53 = vmul.f32 1.442695, %v798_v52 }
 0x30d   : > { %1595 = vpow2.f32 %v799_v53  ;;  %v1377_v53 = vld [vmem:[%s2080_s4] ss:$0 sm:$0xff] }
 0x30f   : > { %v1594_v54 = vpop.eup %1593 }
 0x310   : > { %v690_v55 = vsel %vm525_vm2, %v1594_v54, 0.0  ;;  %v908_v58 = vpop.xlane.xlu1 %907 }
 0x311   : > { %691 = vadd.xlane.f32.xlu1 %v690_v55  ;;  %v909_v59 = vsub.f32 %v900_v38, %v908_v58 }
 0x313   : > { %v910_v60 = vmul.f32 1.442695, %v909_v59 }
 0x315   : > { %1597 = vpow2.f32 %v910_v60 }
 0x317   : > { %v1596_v56 = vpop.eup %1595 }
 0x318   : > { %v801_v57 = vsel %vm525_vm2, %v1596_v56, 0.0 }
 0x319   : > { %802 = vadd.xlane.f32.xlu0 %v801_v57 }
 0x31f   : > { %v1598_v61 = vpop.eup %1597 }
 0x320   : > { %v912_v62 = vsel %vm525_vm2, %v1598_v61, 0.0 }
 0x322   : > { %696 = vrot.lane.b32.xlu1 %v1911_v10, %s1721_s17 }
 0x32f   : > { %584 = vrot.lane.b32.xlu0 %v1911_v10, %s1722_s24 }
 0x333   : > { %918 = vrot.lane.b32.xlu0 %v1911_v10, %s1723_s30  ;;  %s1396_s30 = sshll.u32 %s1820_s29, 7  ;;  %s1728_s29 = smov [#allocation5]  }
 0x334   : > { %s2033_s0 = scalar_lea.hbm %s2089_s13, %s1396_s30 }
 0x346   : > { %913 = vadd.xlane.f32.xlu1 %v912_v62 }
 0x357   : > { %807 = vrot.lane.b32.xlu1 %v1911_v10, %s1724_s16  ;;  %s446_s16 = scalar_lea.vmem [#allocation5], %s1363_s23  ;;  %s1645_s23 = sshll.u32 %s1728_s29, 4  ;;  %s1646_s23 = int_to_ptr.vmem [resolvable:$false] %s1645_s23 }
 0x358   : > { %s1647_s17 = scalar_lea.vmem %s1646_s23, 256 }
 0x396   : > { %v580_v63 = vpop.xlane.xlu0 %579 }
 0x397   : > { %1599 = vrcp.f32 %v580_v63 }
 0x39e   : > { %v692_v1 = vpop.xlane.xlu1 %691 }
 0x39f   : > { %1601 = vrcp.f32 %v692_v1 }
 0x3a1   : > { %v1600_v2 = vpop.eup %1599 }
 0x3a2   : > { %v582_v5 = vmul.f32 %v1600_v2, %v1592_v49  ;;  %v697_v8 = vpop.permute.xlu1 %696 }
 0x3a3   : > { %v702_v12 = vsel %vm589_vm3, %v697_v8, 0 }
 0x3a4   : > { %v583_v9 = vpack.c.bf16 %v582_v5, %v582_v5  ;;  %v1586_v5 = vld [vmem:[#allocation2 + $0x8] sm:$0xff]  }
 0x3a6   : > { %v803_v4 = vpop.xlane.xlu0 %802 }
 0x3a7   : > { %1603 = vrcp.f32 %v803_v4  ;;  %v1585_v4 = vld [vmem:[#allocation2] sm:$0xff]  }
 0x3a9   : > { %v1602_v11 = vpop.eup %1601 }
 0x3aa   : > { %v585_v6 = vpop.permute.xlu0 %584  ;;  %v694_v10 = vmul.f32 %v1602_v11, %v1594_v54 }
 0x3ab   : > { %v591_v7 = vsel %vm589_vm3, %v585_v6, 0 }
 0x3ac   : > { %1444 = vmatpush3.bf16.msra.mxu0 %v591_v7  ;;  %v695_v13 = vpack.c.bf16 %v694_v10, %v694_v10 }
 0x3ad   : > { %1455 = vmatprep.subr.bf16.mxu0 %v1712_v0 }
 0x3ae   : > { %v919_v19 = vpop.permute.xlu0 %918 }
 0x3af   : > { %1446 = vmatmul.mubr.msk.bf16.vlgmr.msra.gmra.mrb[4].mxu0 %vm525_vm2, %v583_v9  ;;  %v924_v21 = vsel %vm589_vm3, %v919_v19, 0  ;;  %v1381_v9 = vld [vmem:[%s2081_s5] ss:$0 sm:$0xff] }
 0x3b0   : > { %1456 = vmatpush3.bf16.msra.mxu0 %v702_v12  ;;  %1457 = vmatprep.mubr.msk.bf16.mxu0 %vm1713_vm0, %v1712_v0  ;;  %v1382_v12 = vld [vmem:[%s2082_s6] ss:$0 sm:$0xff] }
 0x3b1   : > { %1467 = vmatprep.subr.bf16.mxu0 %v1712_v0  ;;  %v1604_v14 = vpop.eup %1603  ;;  %v1383_v19 = vld [vmem:[%s2084_s8] ss:$0 sm:$0xff] }
 0x3b2   : > { %v805_v16 = vmul.f32 %v1604_v14, %v1596_v56 }
 0x3b4   : > { %v806_v20 = vpack.c.bf16 %v805_v16, %v805_v16  ;;  %v1588_v16 = vld [vmem:[%s2085_s9 + $0x8] sm:$0xff]  }
 0x3b7   : > { %1458 = vmatmul.mubr.msk.bf16.vlgmr.msra.gmra.mrb[8].mxu0 %vm525_vm2, %v695_v13 }
 0x3b8   : > { %1469 = vmatprep.mubr.msk.bf16.mxu0 %vm1713_vm0, %v1712_v0 }
 0x3d3   : > { %v914_v15 = vpop.xlane.xlu1 %913 }
 0x3d4   : > { %1605 = vrcp.f32 %v914_v15  ;;  %v1587_v15 = vld [vmem:[%s2085_s9] sm:$0xff]  }
 0x3d7   : > { %v808_v17 = vpop.permute.xlu1 %807 }
 0x3d8   : > { %v813_v18 = vsel %vm589_vm3, %v808_v17, 0  ;;  %v1589_v17 = vld [vmem:[%s2085_s9 + $0x10] sm:$0xff]  }
 0x3d9   : > { %1468 = vmatpush3.bf16.msra.mxu0 %v813_v18  ;;  %v1590_v18 = vld [vmem:[%s2085_s9 + $0x18] sm:$0xff]  }
 0x3da   : > { %1479 = vmatprep.subr.bf16.mxu0 %v1712_v0 }
 0x3dc   : > { %1470 = vmatmul.mubr.msk.bf16.vlgmr.msra.gmra.mrb[12].mxu0 %vm525_vm2, %v806_v20 }
 0x3dd   : > { %1480 = vmatpush3.bf16.msra.mxu0 %v924_v21  ;;  %1481 = vmatprep.mubr.msk.bf16.mxu0 %vm1713_vm0, %v1712_v0 }
 0x3de   : > { %v1606_v22 = vpop.eup %1605  ;;  %1493 = vmatprep.subr.bf16.mxu0 %v1712_v0 }
 0x3df   : > { %v916_v23 = vmul.f32 %v1606_v22, %v1598_v61 }
 0x3e1   : > { %v917_v24 = vpack.c.bf16 %v916_v23, %v916_v23 }
 0x3e4   : > { %1482 = vmatmul.mubr.msk.bf16.vlgmr.msra.gmra.mrb[16].mxu0 %vm525_vm2, %v917_v24 }
 0x3e5   : > { %1497 = vmatprep.mubr.msk.bf16.mxu0 %vm1713_vm0, %v1712_v0  ;;  %1494 = vmatpush3.bf16.msra.mxu0 %v1585_v4 }
 0x3e6   : > { %1495 = vmatprep.subr.bf16.mxu0 %v1712_v0 }
 0x3e9   : > { %1496 = vmatpush3.bf16.msra.mxu0 %v1586_v5 }
 0x482   : > { %v627_v25 = vpop.f32.mrb[4].mxu0 }
 0x483   : > { %v1447_v26 = vpop.f32.mrb[5].mxu0  ;;  %v633_v47 = vpack.c.bf16 %v627_v25, %v627_v25 }
 0x484   : > { %v630_v27 = vpop.f32.mrb[6].mxu0 }
 0x485   : > { %v1448_v28 = vpop.f32.mrb[7].mxu0 }
 0x48a   : > { %v738_v29 = vpop.f32.mrb[8].mxu0 }
 0x48b   : > { %v744_v30 = vpack.c.bf16 %v738_v29, %v738_v29  ;;  %v1459_v31 = vpop.f32.mrb[9].mxu0 }
 0x48c   : > { %v741_v32 = vpop.f32.mrb[10].mxu0 }
 0x48d   : > { %968 = vrot.lane.b32.xlu1 %v744_v30, %s1725_s27  ;;  %v1460_v33 = vpop.f32.mrb[11].mxu0  ;;  %s1286_s27 = sshll.u32 %s446_s16, 4  ;;  %s2035_s27 = int_to_ptr.vmem [resolvable:$true] %s1286_s27 }
 0x48e   : > { %p1648_p2 = scmp.lt.s32.totalorder %s2035_s27, %s1646_s23 }
 0x4af   : > { %v849_v36 = vpop.f32.mrb[12].mxu0 }
 0x4b0   : > { %v855_v37 = vpack.c.bf16 %v849_v36, %v849_v36  ;;  %v1471_v38 = vpop.f32.mrb[13].mxu0 }
 0x4b1   : > { %v852_v39 = vpop.f32.mrb[14].mxu0 }
 0x4b2   : > { %971 = vrot.lane.b32.xlu0 %v855_v37, %s1726_s15  ;;  %v1472_v40 = vpop.f32.mrb[15].mxu0  ;;  %s1273_s15 = scalar_lea.sflag [#allocation4], %s444_s22 }
 0x4b7   : > { %v960_v41 = vpop.f32.mrb[16].mxu0 }
 0x4b8   : > { %v966_v42 = vpack.c.bf16 %v960_v41, %v960_v41  ;;  %v1483_v43 = vpop.f32.mrb[17].mxu0 }
 0x4b9   : > { %v963_v44 = vpop.f32.mrb[18].mxu0 }
 0x4ba   : > { %974 = vrot.lane.b32.xlu1 %v966_v42, %s1727_s21  ;;  %v1484_v45 = vpop.f32.mrb[19].mxu0  ;;  %s1641_s21 = scalar_lea.vmem %s2035_s27, 128 }
 0x4bb   : > { %p1642_p6 = scmp.ne.s32.totalorder %s2035_s27, %s1641_s21  ;;  %p1649_p3 = scmp.lt.s32.totalorder %s1647_s17, %s1641_s21 }
 0x4bd   : > { %p1643_p10 = pnand %p1642_p6, %p2108_p9  ;;  %p1650_p4 = por %p1649_p3, %p1648_p2 }
 0x4bf   : > { %p1644_p12 = pneg %p1643_p10 }
 0x4c1   : > { %p1651_p7 = pnand %p1650_p4, %p1644_p12 }
 0x4ff   : > { %v969_v46 = vpop.permute.xlu1 %968 }
 0x500   : > { %v978_v49 = vsel %vm525_vm2, %v633_v47, %v969_v46 }
 0x524   : > { %v972_v48 = vpop.permute.xlu0 %971 }
 0x525   : > { %v981_v50 = vsel %vm979_vm4, %v978_v49, %v972_v48 }
 0x52c   : > { %v975_v51 = vpop.permute.xlu1 %974 }
 0x52d   : > { %v984_v52 = vsel %vm982_vm5, %v981_v50, %v975_v51  ;;  %v1393_v51 = vld [vmem:[%s2087_s11] ss:$0 sm:$0xff] }
 0x52e   : > { %1490 = vmatmul.mubr.msk.bf16.vlgmr.msra.gmra.mrb[16].mxu1 %vm477_vm1, %v984_v52 }
 0x52f   : > { %1509 = vmatprep.mubr.msk.bf16.mxu1 %vm1713_vm0, %v1712_v0  ;;  %1502 = vmatpush3.bf16.msra.mxu1 %v1587_v15 }
 0x530   : > { %1503 = vmatprep.subr.bf16.mxu1 %v1712_v0 }
 0x533   : > { %1504 = vmatpush3.bf16.msra.mxu1 %v1588_v16 }
 0x534   : > { %1505 = vmatprep.subr.bf16.mxu1 %v1712_v0 }
 0x537   : > { %1506 = vmatpush3.bf16.msra.mxu1 %v1589_v17 }
 0x538   : > { %1507 = vmatprep.subr.bf16.mxu1 %v1712_v0 }
 0x53b   : > { %1508 = vmatpush3.bf16.msra.mxu1 %v1590_v18 }
 0x601   : > { %v1044_v54 = vpop.f32.mrb[16].mxu1 }
 0x602   : > { %v1045_v55 = vadd.f32 %v1377_v53, %v1044_v54  ;;  %v1491_v56 = vpop.f32.mrb[17].mxu1  ;;  %v1394_v53 = vld [vmem:[%s2088_s12] ss:$0 sm:$0xff] }
 0x603   : > { %v1047_v57 = vpop.f32.mrb[18].mxu1 }
 0x604   : > { %v1492_v58 = vpop.f32.mrb[19].mxu1  ;;  %v1050_v59 = vadd.f32 %v1045_v55, %v1899_v3 }
 0x606   : > { %v1053_v60 = vsel %vm477_vm1, %v1050_v59, 0.0 }
 0x607   : > { %1054 = vadd.xlane.f32.xlu0 %v1053_v60 }
 0x694   : > { %v1055_v61 = vpop.xlane.xlu0 %1054 }
 0x695   : > { %v1057_v62 = vmul.f32 0.03125, %v1055_v61 }
 0x697   : > { %v1058_v63 = vsub.f32 %v1050_v59, %v1057_v62 }
 0x699   : > { %v1059_v1 = vmul.f32 %v1058_v63, %v1058_v63 }
 0x69b   : > { %v1060_v2 = vsel %vm477_vm1, %v1059_v1, 0.0 }
 0x69c   : > { %1061 = vadd.xlane.f32.xlu1 %v1060_v2 }
 0x729   : > { %v1062_v6 = vpop.xlane.xlu1 %1061 }
 0x72a   : > { %v1063_v7 = vmul.f32 0.03125, %v1062_v6 }
 0x72c   : > { %v1064_v8 = vadd.f32 1e-05, %v1063_v7 }
 0x72e   : > { %1607 = vrsqrt.f32 %v1064_v8 }
 0x738   : > { %v1608_v3 = vpop.eup %1607 }
 0x739   : > { %v1066_v11 = vmul.f32 %v1608_v3, %v1058_v63 }
 0x73b   : > { %v1073_v10 = vmul.f32 %v1381_v9, %v1066_v11 }
 0x73d   : > { %v1080_v13 = vadd.f32 %v1382_v12, %v1073_v10 }
 0x73f   : > { %v1081_v14 = vpack.c.bf16 %v1080_v13, %v1080_v13 }
 0x741   : > { %1498 = vmatmul.mubr.msk.bf16.vlgmr.msra.gmra.mrb[20].mxu0 %vm477_vm1, %v1081_v14 }
 0x814   : > { %v1142_v20 = vpop.f32.mrb[20].mxu0 }
 0x815   : > { %v1143_v21 = vadd.f32 %v1383_v19, %v1142_v20  ;;  %v1499_v22 = vpop.f32.mrb[21].mxu0 }
 0x816   : > { %v1145_v23 = vpop.f32.mrb[22].mxu0 }
 0x817   : > { %v1149_v24 = vmul.f32 0.044715, %v1143_v21  ;;  %v1500_v25 = vpop.f32.mrb[23].mxu0  ;;  %v1148_v31 = vmul.f32 0.5, %v1143_v21 }
 0x819   : > { %v1150_v26 = vmul.f32 %v1149_v24, %v1143_v21 }
 0x81b   : > { %v1151_v27 = vmul.f32 %v1150_v26, %v1143_v21 }
 0x81d   : > { %v1152_v28 = vadd.f32 %v1151_v27, %v1143_v21 }
 0x81f   : > { %v1153_v29 = vmul.f32 0.7978845, %v1152_v28 }
 0x821   : > { %1609 = vtanh.f32 %v1153_v29 }
 0x82b   : > { %v1610_v30 = vpop.eup %1609 }
 0x82c   : > { %v1155_v32 = vadd.f32 1.0, %v1610_v30 }
 0x82e   : > { %v1156_v0 = vmul.f32 %v1155_v32, %v1148_v31 }
 0x830   : > { %v1157_v33 = vpack.c.bf16 %v1156_v0, %v1156_v0 }
 0x832   : > { %1510 = vmatmul.mubr.msk.bf16.vlgmr.msra.gmra.mrb[20].mxu1 %vm1197_vm6, %v1157_v33 }
 0x905   : > { %v1235_v35 = vpop.f32.mrb[20].mxu1 }
 0x906   : > { %v1236_v36 = vadd.f32 %v1387_v34, %v1235_v35  ;;  %v1511_v37 = vpop.f32.mrb[21].mxu1 }
 0x907   : > { %v1238_v38 = vpop.f32.mrb[22].mxu1 }
 0x908   : > { %v1512_v39 = vpop.f32.mrb[23].mxu1  ;;  %v1241_v40 = vadd.f32 %v1236_v36, %v1080_v13 }
 0x90a   : > { %v1244_v41 = vsel %vm477_vm1, %v1241_v40, 0.0 }
 0x90b   : > { %1245 = vadd.xlane.f32.xlu0 %v1244_v41 }
 0x998   : > { %v1246_v42 = vpop.xlane.xlu0 %1245 }
 0x999   : > { %v1247_v43 = vmul.f32 0.03125, %v1246_v42 }
 0x99b   : > { %v1248_v44 = vsub.f32 %v1241_v40, %v1247_v43 }
 0x99d   : > { %v1249_v45 = vmul.f32 %v1248_v44, %v1248_v44 }
 0x99f   : > { %v1250_v46 = vsel %vm477_vm1, %v1249_v45, 0.0 }
 0x9a0   : > { %1251 = vadd.xlane.f32.xlu0 %v1250_v46 }
 0xa2d   : > { %v1252_v47 = vpop.xlane.xlu0 %1251 }
 0xa2e   : > { %v1253_v48 = vmul.f32 0.03125, %v1252_v47 }
 0xa30   : > { %v1254_v49 = vadd.f32 1e-05, %v1253_v48 }
 0xa32   : > { %1611 = vrsqrt.f32 %v1254_v49 }
 0xa3c   : > { %v1612_v50 = vpop.eup %1611 }
 0xa3d   : > { %v1256_v52 = vmul.f32 %v1612_v50, %v1248_v44 }
 0xa3f   : > { %v1263_v54 = vmul.f32 %v1393_v51, %v1256_v52 }
 0xa41   : > { %v1270_v55 = vadd.f32 %v1394_v53, %v1263_v54 }
 0xa43   : > { %1271 = vst.msk [vmem:[%s446_s16] sm:$0xff] %vm477_vm1, %v1270_v55 }
 0xa44   : > { %1654 = shalt.err (!%p1651_p7)
}
 0xa45   : > { %s1655_s22 = scalar_lea.hbm %s2033_s0, 128  ;;  %s1659_s16 = scalar_lea.hbm %s2089_s13, 256 }
 0xa46   : > { %p1656_p8 = scmp.ne.s32.totalorder %s2033_s0, %s1655_s22  ;;  %p1660_p1 = scmp.lt.u32.totalorder %s2033_s0, %s2089_s13 }
 0xa47   : > { %p1661_p0 = scmp.lt.u32.totalorder %s1659_s16, %s1655_s22  ;;  %p1663_p6 = scmp.lt.u32.totalorder %s1655_s22, %s2033_s0 }
 0xa48   : > { %p1657_p11 = pnand %p1656_p8, %p2108_p9 }
 0xa49   : > { %p1662_p5 = por %p1661_p0, %p1660_p1 }
 0xa4a   : > { %p1658_p13 = pneg %p1657_p11 }
 0xa4b   : > { %p1664_p10 = por %p1663_p6, %p1662_p5 }
 0xa4d   : > { %p1665_p12 = pnand %p1664_p10, %p1658_p13 }
 0xa4f   : > { %1668 = shalt.err (!%p1665_p12)
}
 0xa50   : > { %1517 = dma.vmem_to_hbm [thread:$0]  (%p2108_p9), %s2035_s27, 128, %s2033_s0, %s1273_s15  }
 0xa51 PF: > { %p1529_p2 = scmp.ge.s32.totalorder %s1707_s28, 2  ;;  %s1298_s21 = sand.u32 1, %s1695_s25  }
 0xa52   : > { %p2109_p3 = scmp.ne.s32.totalorder %s2101_s19, 0  ;;  %s1299_s29 = scalar_lea.sflag [#allocation4], %s1298_s21 }
 0xa54   : > { %p1524_p4 = pnand %p1529_p2, %p2109_p3 }
 0xa56   : > { %1690 = dma.done.wait (!%p1524_p4), %s1299_s29, 128  }
 0xa57   : > { %1692 = vsyncadd (!%p1524_p4), %s1299_s29, 4294967168  ;;  %s2110_s28 = sld [smem:[#allocation9_spill]]  ;;  %s2111_s23 = sld [smem:[#allocation8_spill]] }
 0xa58   : > { %s2112_s27 = sld [smem:[#allocation10_spill]]  ;;  %s2113_s25 = smov %s1699_s26 }
 0xa5d   : > { %p24_p7 = scmp.ge.s32.totalorder %s2110_s28, 4   ;;  %s2114_s26 = smov %s2111_s23 }
 0xa5f   :  { %26 = sbr.rel (!%p24_p7) target bundleno = 6 (0x6), region = 112 }
 0xa66   :  { %1304 = vsyncpa [#allocation3], 1 }
 0xa67   :  { %1306 = vsyncpa [#allocation3 + $0x1], 1 }
 0xa68   :  { %1307 = vsyncpa [#allocation4], 1 }
 0xa69   :  { %1309 = vsyncpa [#allocation4 + $0x1], 1 }

// kernel: tpu_custom_call.1
= control target key start
LH: loop header
LB: loop body
LE: loop exit
PB: predicated region body
PF: predicated region fallthrough
CT: control target
= control target key end

     0   :  { %s2076_s0 = inlined_call_operand.vmem [shape: f32[16,32], index: 0, kind: input, shape index: {}]   ;;  %s2077_s1 = inlined_call_operand.vmem [shape: bf16[32,96], index: 1, kind: input, shape index: {}]   ;;  %s2078_s2 = inlined_call_operand.vmem [shape: f32[1,96], index: 2, kind: input, shape index: {}]   ;;  %s2079_s3 = inlined_call_operand.vmem [shape: bf16[32,32], index: 3, kind: input, shape index: {}]   ;;  %s2080_s4 = inlined_call_operand.vmem [shape: f32[1,32], index: 4, kind: input, shape index: {}]   ;;  %s2081_s5 = inlined_call_operand.vmem [shape: f32[1,32], index: 5, kind: input, shape index: {}]   ;;  %s2082_s6 = inlined_call_operand.vmem [shape: f32[1,32], index: 6, kind: input, shape index: {}]   ;;  %s2083_s7 = inlined_call_operand.hbm [shape: bf16[32,64], index: 7, kind: input, shape index: {}]   ;;  %s2084_s8 = inlined_call_operand.vmem [shape: f32[1,64], index: 8, kind: input, shape index: {}]   ;;  %s2085_s9 = inlined_call_operand.vmem [shape: bf16[64,32], index: 9, kind: input, shape index: {}]   ;;  %s2086_s10 = inlined_call_operand.vmem [shape: f32[1,32], index: 10, kind: input, shape index: {}]   ;;  %s2087_s11 = inlined_call_operand.vmem [shape: f32[1,32], index: 11, kind: input, shape index: {}]   ;;  %s2088_s12 = inlined_call_operand.vmem [shape: f32[1,32], index: 12, kind: input, shape index: {}]   ;;  %s2089_s13 = inlined_call_operand.hbm [shape: f32[16,32], index: 13, kind: output, shape index: {}]  }
   0x1   :  { %2096 = sst [smem:[#allocation11_spill]] %s2076_s0 }
   0x2   :  { %18 = vsyncpa [#allocation3], 0 }
   0x3   :  { %19 = vsyncpa [#allocation4], 0 }
   0x4   :  { %21 = vsyncpa [#allocation4 + $0x1], 0  ;;  %s1799_s25 = smov 0   ;;  %s1801_s26 = smov 0  }
   0x5   :  { %s1803_s27 = smov 0   ;;  %s1805_s28 = smov 0  }
   0x6 LB: > { %2097 = sst [smem:[#allocation8_spill]] %s1703_s27  ;;  %s1820_s29 = sadd.s32 4294967295, %s1707_s28   ;;  %s1707_s28 = sphi %s1805_s28, %s2110_s28   ;;  %s1703_s27 = sphi %s1803_s27, %s2112_s27   ;;  %s1699_s26 = sphi %s1801_s26, %s2114_s26   ;;  %s1695_s25 = sphi %s1799_s25, %s2113_s25  }
   0x7   : > { %s1357_s30 = sadd.s32 4294967294, %s1707_s28   ;;  %s1824_s14 = sadd.s32 1, %s1707_s28  }
   0x8   : > { %2098 = sst [smem:[#allocation9_spill]] %s1824_s14  ;;  %s312_s15 = sadd.s32 1, %s1703_s27 }
   0x9   : > { %s309_s16 = ssub.s32 %s1707_s28, %s1824_s14  ;;  %p322_p0 = scmp.ne.s32.totalorder %s1703_s27, %s1699_s26 }
   0xa   : > { %p310_p1 = scmp.eq.s32.totalorder %s309_s16, 0  ;;  %p323_p2 = scmp.eq.s32.totalorder %s1820_s29, 1 }
   0xb   : > { %p328_p3 = scmp.ne.s32.totalorder %s1699_s26, %s1695_s25  ;;  %p329_p4 = scmp.eq.s32.totalorder %s1357_s30, 1 }
   0xc   : > { %s1835_s17 = scalar_select %p310_p1, %s1703_s27, %s312_s15  }
   0xd   : > { %p1837_p5 = por %p323_p2, %p322_p0  ;;  %p1841_p6 = por %p329_p4, %p328_p3 }
   0xe   : > { %2099 = sst [smem:[#allocation10_spill]] %s1835_s17  ;;  %p1358_p7 = scmp.ge.s32.totalorder %s1707_s28, 1 }
   0xf   : > { %s2100_s18 = scalar_select %p1837_p5, 1, 0 }
  0x10   : > { %s2101_s19 = scalar_select %p1841_p6, 1, 0 }
  0x11   : > { %p336_p8 = scmp.lt.s32.totalorder %s1707_s28, 3  ;;  %p2093_p9 = scmp.eq.s32.totalorder %s1820_s29, 0 }
  0x12   : > { %s1709_s21 = smov [#allocation2]   ;;  %s1613_s15 = scalar_lea.hbm %s2083_s7, 256 }
  0x13   : > { %p1848_p10 = pnand %p1358_p7, %p336_p8  ;;  %s366_s22 = sshll.u32 %s1709_s21, 4  ;;  %s367_s22 = int_to_ptr.vmem [resolvable:$true] %s366_s22 }
  0x14   : > { %p1614_p13 = scmp.ne.s32.totalorder %s2083_s7, %s1613_s15  ;;  %p1620_p3 = scmp.lt.u32.totalorder %s1613_s15, %s2083_s7 }
  0x15   : > { %s2102_s20 = scalar_select %p1848_p10, 1, 0 }
  0x16   : > { %p1519_p11 = pneg %p1848_p10 }
  0x18   : > { %p1856_p12 = pnand %p2093_p9, %p1519_p11 }
  0x1a   : > { %p1615_p0 = pneg %p1856_p12 }
  0x1c   : > { %p1616_p1 = pnand %p1615_p0, %p1614_p13 }
  0x1e   : > { %p1617_p2 = pneg %p1616_p1 }
  0x20   : > { %p1622_p4 = pnand %p1620_p3, %p1617_p2 }
  0x22   : > { %1625 = shalt.err (!%p1622_p4)
}
  0x23   : > { %s1626_s14 = scalar_lea.vmem %s367_s22, 256  ;;  %p1634_p9 = scmp.lt.s32.totalorder %s367_s22, %s367_s22 }
  0x24   : > { %p1627_p7 = scmp.ne.s32.totalorder %s367_s22, %s1626_s14  ;;  %p1635_p6 = scmp.lt.s32.totalorder %s1626_s14, %s1626_s14 }
  0x26   : > { %p1629_p8 = pnand %p1627_p7, %p1615_p0  ;;  %p1636_p5 = por %p1635_p6, %p1634_p9 }
  0x28   : > { %p1630_p11 = pneg %p1629_p8 }
  0x2a   : > { %p1637_p10 = pnand %p1636_p5, %p1630_p11 }
  0x2c   : > { %1640 = shalt.err (!%p1637_p10)
}
  0x2d   : > { %s1710_s17 = smov 64   ;;  %s1711_s24 = smov 4  }
  0x2e   : > { %1522 = dma.hbm_to_vmem [thread:$0]  (!%p1856_p12), %s2083_s7, 256, %s367_s22, [#allocation3], %s1710_s17, %s1710_s17, %s1711_s24  }
  0x2f   : > { %p2104_p13 = scmp.ne.s32.totalorder %s2102_s20, 0 }
  0x30   : > { %p2105_p1 = scmp.eq.s32.totalorder (!%p2104_p13), %s1820_s29, 0 }
  0x31   : > { %404 = sbr.rel (%p2104_p13) target bundleno = 2641 (0xa51), region = 72 }
  0x38   : > { %1686 = dma.done.wait (%p2105_p1), [#allocation3], 256   ;;  %p2106_p0 = pmov %p2105_p1 }
  0x39   : > { %p447_p5 = scmp.lt.s32.totalorder %s1820_s29, 1  ;;  %v1712_v0 = vmov 0.0   ;;  %vm1713_vm0 = vmmov 0   ;;  %s2107_s0 = sld [smem:[#allocation11_spill]]  ;;  %v1581_v1 = vld [vmem:[%s2077_s1] sm:$0xff]   ;;  %v1582_v2 = vld [vmem:[%s2077_s1 + $0x8] sm:$0xff]  }
  0x3a   : > { %1688 = vsyncadd (%p2106_p0), [#allocation3], 4294967040  ;;  %1429 = vmatprep.subr.bf16.mxu0 %v1712_v0  ;;  %1433 = vmatprep.mubr.msk.bf16.mxu0 %vm1713_vm0, %v1712_v0  ;;  %vm477_vm1 = vcmask 261120   ;;  %v1365_v5 = vld [vmem:[%s2078_s2] ss:$0 sm:$0xff]  ;;  %s1716_s20 = smov 80  }
  0x3b   : > { %s448_s27 = scalar_select %p447_p5, %s1820_s29, 1  ;;  %1437 = vmatprep.subr.bf16.mxu1 %v1712_v0  ;;  %1439 = vmatprep.mubr.msk.bf16.mxu1 %vm1713_vm0, %v1712_v0  ;;  %vm525_vm2 = vcmask 64512   ;;  %vm589_vm3 = vcmask 1043456   ;;  %vm979_vm4 = vcmask 130048   ;;  %vm982_vm5 = vcmask 195584  }
  0x3c   : > { %1430 = vmatpush3.bf16.msra.mxu0 %v1581_v1  ;;  %s1717_s22 = smov 88   ;;  %s1719_s15 = smov 112   ;;  %vm1197_vm6 = vcmask 523264  }
  0x3d   : > { %s1364_s14 = sshll.u32 %s448_s27, 3  ;;  %1431 = vmatprep.subr.bf16.mxu0 %v1712_v0  ;;  %s1714_s27 = smov 120  }
  0x3e   : > { %s1720_s21 = smov 104   ;;  %s1721_s17 = smov 56  }
  0x3f   : > { %s450_s23 = scalar_lea.vmem %s2107_s0, %s1364_s14  ;;  %s1715_s14 = smov 96  }
  0x40   : > { %v1899_v3 = vld [vmem:[%s450_s23] sm:$0xff]  ;;  %1432 = vmatpush3.bf16.msra.mxu0 %v1582_v2  ;;  %s1718_s23 = smov 72   ;;  %s1722_s24 = smov 64  }
  0x41   : > { %v453_v4 = vpack.c.bf16 %v1899_v3, %v1899_v3  ;;  %1443 = vmatprep.subr.bf16.mxu0 %v1712_v0  ;;  %s1723_s30 = smov 40   ;;  %s1724_s16 = smov 48  }
  0x42   : > { %p2108_p9 = scmp.ne.s32.totalorder %s2100_s18, 0 }
  0x43   : > { %1434 = vmatmul.mubr.msk.bf16.vlgmr.msra.gmra.mrb[0].mxu0 %vm477_vm1, %v453_v4 }
  0x44   : > { %1445 = vmatprep.mubr.msk.bf16.mxu0 %vm1713_vm0, %v1712_v0 }
 0x116   : > { %v515_v6 = vpop.f32.mrb[0].mxu0 }
 0x117   : > { %v516_v7 = vadd.f32 %v1365_v5, %v515_v6  ;;  %v1435_v8 = vpop.f32.mrb[1].mxu0 }
 0x118   : > { %v518_v9 = vpop.f32.mrb[2].mxu0 }
 0x119   : > { %v1911_v10 = vpack.c.bf16 %v516_v7, %v516_v7  ;;  %v1436_v11 = vpop.f32.mrb[3].mxu0 }
 0x11b   : > { %634 = vrot.lane.b32.xlu1 %v1911_v10, %s1714_s27  ;;  %523 = vrot.lane.b32.xlu0 %v1911_v10, %s1715_s14  ;;  %s1725_s27 = smov 8  }
 0x11f   : > { %747 = vrot.lane.b32.xlu1 %v1911_v10, %s1716_s20  ;;  %636 = vrot.lane.b32.xlu0 %v1911_v10, %s1717_s22  ;;  %s444_s22 = sand.u32 1, %s1699_s26  }
 0x123   : > { %858 = vrot.lane.b32.xlu1 %v1911_v10, %s1718_s23  ;;  %745 = vrot.lane.b32.xlu0 %v1911_v10, %s1719_s15  ;;  %s1726_s15 = smov 16   ;;  %s1363_s23 = sshll.u32 %s444_s22, 3 }
 0x127   : > { %856 = vrot.lane.b32.xlu0 %v1911_v10, %s1720_s21  ;;  %s1727_s21 = smov 24  }
 0x18d   : > { %v524_v12 = vpop.permute.xlu0 %523  ;;  %v635_v15 = vpop.permute.xlu1 %634 }
 0x18e   : > { %v530_v13 = vsel %vm525_vm2, %v524_v12, 0 }
 0x18f   : > { %1438 = vmatpush3.bf16.xpose.msra.mxu1 %v530_v13 }
 0x190   : > { %1449 = vmatprep.subr.bf16.mxu1 %v1712_v0 }
 0x191   : > { %v637_v14 = vpop.permute.xlu0 %636  ;;  %v748_v17 = vpop.permute.xlu1 %747 }
 0x192   : > { %v642_v16 = vsel %vm525_vm2, %v637_v14, 0  ;;  %v753_v18 = vsel %vm525_vm2, %v748_v17, 0 }
 0x195   : > { %v859_v19 = vpop.permute.xlu1 %858  ;;  %v746_v20 = vpop.permute.xlu0 %745 }
 0x196   : > { %1440 = vmatmul.mubr.msk.bf16.vlgmr.msra.gmra.mrb[0].mxu1 %vm525_vm2, %v1911_v10  ;;  %v864_v21 = vsel %vm525_vm2, %v859_v19, 0 }
 0x197   : > { %1450 = vmatpush3.bf16.xpose.msra.mxu1 %v642_v16  ;;  %1451 = vmatprep.mubr.msk.bf16.mxu1 %vm1713_vm0, %v1712_v0 }
 0x198   : > { %1461 = vmatprep.subr.bf16.mxu1 %v1712_v0 }
 0x199   : > { %v857_v22 = vpop.permute.xlu0 %856 }
 0x19e   : > { %1452 = vmatmul.mubr.msk.bf16.vlgmr.msra.gmra.mrb[4].mxu1 %vm525_vm2, %v635_v15 }
 0x19f   : > { %1462 = vmatpush3.bf16.xpose.msra.mxu1 %v753_v18  ;;  %1463 = vmatprep.mubr.msk.bf16.mxu1 %vm1713_vm0, %v1712_v0 }
 0x1a0   : > { %1473 = vmatprep.subr.bf16.mxu1 %v1712_v0 }
 0x1a6   : > { %1464 = vmatmul.mubr.msk.bf16.vlgmr.msra.gmra.mrb[8].mxu1 %vm525_vm2, %v746_v20 }
 0x1a7   : > { %1474 = vmatpush3.bf16.xpose.msra.mxu1 %v864_v21  ;;  %1475 = vmatprep.mubr.msk.bf16.mxu1 %vm1713_vm0, %v1712_v0 }
 0x1a8   : > { %1485 = vmatprep.subr.bf16.mxu1 %v1712_v0 }
 0x1ae   : > { %1476 = vmatmul.mubr.msk.bf16.vlgmr.msra.gmra.mrb[12].mxu1 %vm525_vm2, %v857_v22 }
 0x1af   : > { %1489 = vmatprep.mubr.msk.bf16.mxu1 %vm1713_vm0, %v1712_v0 }
 0x269   : > { %v566_v23 = vpop.f32.mrb[0].mxu1 }
 0x26a   : > { %v1441_v24 = vpop.f32.mrb[1].mxu1  ;;  %v572_v25 = vsel %vm525_vm2, %v566_v23, -inf }
 0x26b   : > { %573 = vmax.xlane.f32.xlu1 %v572_v25  ;;  %v569_v26 = vpop.f32.mrb[2].mxu1 }
 0x26c   : > { %v1442_v27 = vpop.f32.mrb[3].mxu1 }
 0x271   : > { %v678_v28 = vpop.f32.mrb[4].mxu1 }
 0x272   : > { %v1453_v29 = vpop.f32.mrb[5].mxu1  ;;  %v684_v30 = vsel %vm525_vm2, %v678_v28, -inf }
 0x273   : > { %685 = vmax.xlane.f32.xlu0 %v684_v30  ;;  %v681_v31 = vpop.f32.mrb[6].mxu1 }
 0x274   : > { %v1454_v32 = vpop.f32.mrb[7].mxu1 }
 0x279   : > { %v789_v33 = vpop.f32.mrb[8].mxu1 }
 0x27a   : > { %v1465_v34 = vpop.f32.mrb[9].mxu1  ;;  %v795_v35 = vsel %vm525_vm2, %v789_v33, -inf }
 0x27b   : > { %796 = vmax.xlane.f32.xlu0 %v795_v35  ;;  %v792_v36 = vpop.f32.mrb[10].mxu1  ;;  %v1583_v34 = vld [vmem:[%s2079_s3] sm:$0xff]   ;;  %v1584_v35 = vld [vmem:[%s2079_s3 + $0x8] sm:$0xff]  }
 0x27c   : > { %v1466_v37 = vpop.f32.mrb[11].mxu1  ;;  %1486 = vmatpush3.bf16.msra.mxu1 %v1583_v34  ;;  %v1387_v34 = vld [vmem:[%s2086_s10] ss:$0 sm:$0xff] }
 0x27d   : > { %1487 = vmatprep.subr.bf16.mxu1 %v1712_v0 }
 0x280   : > { %1488 = vmatpush3.bf16.msra.mxu1 %v1584_v35 }
 0x281   : > { %v900_v38 = vpop.f32.mrb[12].mxu1  ;;  %1501 = vmatprep.subr.bf16.mxu1 %v1712_v0 }
 0x282   : > { %v1477_v39 = vpop.f32.mrb[13].mxu1  ;;  %v906_v40 = vsel %vm525_vm2, %v900_v38, -inf }
 0x283   : > { %907 = vmax.xlane.f32.xlu1 %v906_v40  ;;  %v903_v41 = vpop.f32.mrb[14].mxu1 }
 0x284   : > { %v1478_v42 = vpop.f32.mrb[15].mxu1 }
 0x2f8   : > { %v574_v43 = vpop.xlane.xlu1 %573 }
 0x2f9   : > { %v575_v44 = vsub.f32 %v566_v23, %v574_v43 }
 0x2fb   : > { %v576_v45 = vmul.f32 1.442695, %v575_v44 }
 0x2fd   : > { %1591 = vpow2.f32 %v576_v45 }
 0x300   : > { %v686_v46 = vpop.xlane.xlu0 %685 }
 0x301   : > { %v687_v47 = vsub.f32 %v678_v28, %v686_v46 }
 0x303   : > { %v688_v48 = vmul.f32 1.442695, %v687_v47 }
 0x305   : > { %1593 = vpow2.f32 %v688_v48 }
 0x307   : > { %v1592_v49 = vpop.eup %1591 }
 0x308   : > { %v797_v50 = vpop.xlane.xlu0 %796  ;;  %v578_v51 = vsel %vm525_vm2, %v1592_v49, 0.0 }
 0x309   : > { %v798_v52 = vsub.f32 %v789_v33, %v797_v50  ;;  %579 = vadd.xlane.f32.xlu0 %v578_v51 }
 0x30b   : > { %v799_v53 = vmul.f32 1.442695, %v798_v52 }
 0x30d   : > { %1595 = vpow2.f32 %v799_v53  ;;  %v1377_v53 = vld [vmem:[%s2080_s4] ss:$0 sm:$0xff] }
 0x30f   : > { %v1594_v54 = vpop.eup %1593 }
 0x310   : > { %v690_v55 = vsel %vm525_vm2, %v1594_v54, 0.0  ;;  %v908_v58 = vpop.xlane.xlu1 %907 }
 0x311   : > { %691 = vadd.xlane.f32.xlu1 %v690_v55  ;;  %v909_v59 = vsub.f32 %v900_v38, %v908_v58 }
 0x313   : > { %v910_v60 = vmul.f32 1.442695, %v909_v59 }
 0x315   : > { %1597 = vpow2.f32 %v910_v60 }
 0x317   : > { %v1596_v56 = vpop.eup %1595 }
 0x318   : > { %v801_v57 = vsel %vm525_vm2, %v1596_v56, 0.0 }
 0x319   : > { %802 = vadd.xlane.f32.xlu0 %v801_v57 }
 0x31f   : > { %v1598_v61 = vpop.eup %1597 }
 0x320   : > { %v912_v62 = vsel %vm525_vm2, %v1598_v61, 0.0 }
 0x322   : > { %696 = vrot.lane.b32.xlu1 %v1911_v10, %s1721_s17 }
 0x32f   : > { %584 = vrot.lane.b32.xlu0 %v1911_v10, %s1722_s24 }
 0x333   : > { %918 = vrot.lane.b32.xlu0 %v1911_v10, %s1723_s30  ;;  %s1396_s30 = sshll.u32 %s1820_s29, 7  ;;  %s1728_s29 = smov [#allocation5]  }
 0x334   : > { %s2033_s0 = scalar_lea.hbm %s2089_s13, %s1396_s30 }
 0x346   : > { %913 = vadd.xlane.f32.xlu1 %v912_v62 }
 0x357   : > { %807 = vrot.lane.b32.xlu1 %v1911_v10, %s1724_s16  ;;  %s446_s16 = scalar_lea.vmem [#allocation5], %s1363_s23  ;;  %s1645_s23 = sshll.u32 %s1728_s29, 4  ;;  %s1646_s23 = int_to_ptr.vmem [resolvable:$false] %s1645_s23 }
 0x358   : > { %s1647_s17 = scalar_lea.vmem %s1646_s23, 256 }
 0x396   : > { %v580_v63 = vpop.xlane.xlu0 %579 }
 0x397   : > { %1599 = vrcp.f32 %v580_v63 }
 0x39e   : > { %v692_v1 = vpop.xlane.xlu1 %691 }
 0x39f   : > { %1601 = vrcp.f32 %v692_v1 }
 0x3a1   : > { %v1600_v2 = vpop.eup %1599 }
 0x3a2   : > { %v582_v5 = vmul.f32 %v1600_v2, %v1592_v49  ;;  %v697_v8 = vpop.permute.xlu1 %696 }
 0x3a3   : > { %v702_v12 = vsel %vm589_vm3, %v697_v8, 0 }
 0x3a4   : > { %v583_v9 = vpack.c.bf16 %v582_v5, %v582_v5  ;;  %v1586_v5 = vld [vmem:[#allocation2 + $0x8] sm:$0xff]  }
 0x3a6   : > { %v803_v4 = vpop.xlane.xlu0 %802 }
 0x3a7   : > { %1603 = vrcp.f32 %v803_v4  ;;  %v1585_v4 = vld [vmem:[#allocation2] sm:$0xff]  }
 0x3a9   : > { %v1602_v11 = vpop.eup %1601 }
 0x3aa   : > { %v585_v6 = vpop.permute.xlu0 %584  ;;  %v694_v10 = vmul.f32 %v1602_v11, %v1594_v54 }
 0x3ab   : > { %v591_v7 = vsel %vm589_vm3, %v585_v6, 0 }
 0x3ac   : > { %1444 = vmatpush3.bf16.msra.mxu0 %v591_v7  ;;  %v695_v13 = vpack.c.bf16 %v694_v10, %v694_v10 }
 0x3ad   : > { %1455 = vmatprep.subr.bf16.mxu0 %v1712_v0 }
 0x3ae   : > { %v919_v19 = vpop.permute.xlu0 %918 }
 0x3af   : > { %1446 = vmatmul.mubr.msk.bf16.vlgmr.msra.gmra.mrb[4].mxu0 %vm525_vm2, %v583_v9  ;;  %v924_v21 = vsel %vm589_vm3, %v919_v19, 0  ;;  %v1381_v9 = vld [vmem:[%s2081_s5] ss:$0 sm:$0xff] }
 0x3b0   : > { %1456 = vmatpush3.bf16.msra.mxu0 %v702_v12  ;;  %1457 = vmatprep.mubr.msk.bf16.mxu0 %vm1713_vm0, %v1712_v0  ;;  %v1382_v12 = vld [vmem:[%s2082_s6] ss:$0 sm:$0xff] }
 0x3b1   : > { %1467 = vmatprep.subr.bf16.mxu0 %v1712_v0  ;;  %v1604_v14 = vpop.eup %1603  ;;  %v1383_v19 = vld [vmem:[%s2084_s8] ss:$0 sm:$0xff] }
 0x3b2   : > { %v805_v16 = vmul.f32 %v1604_v14, %v1596_v56 }
 0x3b4   : > { %v806_v20 = vpack.c.bf16 %v805_v16, %v805_v16  ;;  %v1588_v16 = vld [vmem:[%s2085_s9 + $0x8] sm:$0xff]  }
 0x3b7   : > { %1458 = vmatmul.mubr.msk.bf16.vlgmr.msra.gmra.mrb[8].mxu0 %vm525_vm2, %v695_v13 }
 0x3b8   : > { %1469 = vmatprep.mubr.msk.bf16.mxu0 %vm1713_vm0, %v1712_v0 }
 0x3d3   : > { %v914_v15 = vpop.xlane.xlu1 %913 }
 0x3d4   : > { %1605 = vrcp.f32 %v914_v15  ;;  %v1587_v15 = vld [vmem:[%s2085_s9] sm:$0xff]  }
 0x3d7   : > { %v808_v17 = vpop.permute.xlu1 %807 }
 0x3d8   : > { %v813_v18 = vsel %vm589_vm3, %v808_v17, 0  ;;  %v1589_v17 = vld [vmem:[%s2085_s9 + $0x10] sm:$0xff]  }
 0x3d9   : > { %1468 = vmatpush3.bf16.msra.mxu0 %v813_v18  ;;  %v1590_v18 = vld [vmem:[%s2085_s9 + $0x18] sm:$0xff]  }
 0x3da   : > { %1479 = vmatprep.subr.bf16.mxu0 %v1712_v0 }
 0x3dc   : > { %1470 = vmatmul.mubr.msk.bf16.vlgmr.msra.gmra.mrb[12].mxu0 %vm525_vm2, %v806_v20 }
 0x3dd   : > { %1480 = vmatpush3.bf16.msra.mxu0 %v924_v21  ;;  %1481 = vmatprep.mubr.msk.bf16.mxu0 %vm1713_vm0, %v1712_v0 }
 0x3de   : > { %v1606_v22 = vpop.eup %1605  ;;  %1493 = vmatprep.subr.bf16.mxu0 %v1712_v0 }
 0x3df   : > { %v916_v23 = vmul.f32 %v1606_v22, %v1598_v61 }
 0x3e1   : > { %v917_v24 = vpack.c.bf16 %v916_v23, %v916_v23 }
 0x3e4   : > { %1482 = vmatmul.mubr.msk.bf16.vlgmr.msra.gmra.mrb[16].mxu0 %vm525_vm2, %v917_v24 }
 0x3e5   : > { %1497 = vmatprep.mubr.msk.bf16.mxu0 %vm1713_vm0, %v1712_v0  ;;  %1494 = vmatpush3.bf16.msra.mxu0 %v1585_v4 }
 0x3e6   : > { %1495 = vmatprep.subr.bf16.mxu0 %v1712_v0 }
 0x3e9   : > { %1496 = vmatpush3.bf16.msra.mxu0 %v1586_v5 }
 0x482   : > { %v627_v25 = vpop.f32.mrb[4].mxu0 }
 0x483   : > { %v1447_v26 = vpop.f32.mrb[5].mxu0  ;;  %v633_v47 = vpack.c.bf16 %v627_v25, %v627_v25 }
 0x484   : > { %v630_v27 = vpop.f32.mrb[6].mxu0 }
 0x485   : > { %v1448_v28 = vpop.f32.mrb[7].mxu0 }
 0x48a   : > { %v738_v29 = vpop.f32.mrb[8].mxu0 }
 0x48b   : > { %v744_v30 = vpack.c.bf16 %v738_v29, %v738_v29  ;;  %v1459_v31 = vpop.f32.mrb[9].mxu0 }
 0x48c   : > { %v741_v32 = vpop.f32.mrb[10].mxu0 }
 0x48d   : > { %968 = vrot.lane.b32.xlu1 %v744_v30, %s1725_s27  ;;  %v1460_v33 = vpop.f32.mrb[11].mxu0  ;;  %s1286_s27 = sshll.u32 %s446_s16, 4  ;;  %s2035_s27 = int_to_ptr.vmem [resolvable:$true] %s1286_s27 }
 0x48e   : > { %p1648_p2 = scmp.lt.s32.totalorder %s2035_s27, %s1646_s23 }
 0x4af   : > { %v849_v36 = vpop.f32.mrb[12].mxu0 }
 0x4b0   : > { %v855_v37 = vpack.c.bf16 %v849_v36, %v849_v36  ;;  %v1471_v38 = vpop.f32.mrb[13].mxu0 }
 0x4b1   : > { %v852_v39 = vpop.f32.mrb[14].mxu0 }
 0x4b2   : > { %971 = vrot.lane.b32.xlu0 %v855_v37, %s1726_s15  ;;  %v1472_v40 = vpop.f32.mrb[15].mxu0  ;;  %s1273_s15 = scalar_lea.sflag [#allocation4], %s444_s22 }
 0x4b7   : > { %v960_v41 = vpop.f32.mrb[16].mxu0 }
 0x4b8   : > { %v966_v42 = vpack.c.bf16 %v960_v41, %v960_v41  ;;  %v1483_v43 = vpop.f32.mrb[17].mxu0 }
 0x4b9   : > { %v963_v44 = vpop.f32.mrb[18].mxu0 }
 0x4ba   : > { %974 = vrot.lane.b32.xlu1 %v966_v42, %s1727_s21  ;;  %v1484_v45 = vpop.f32.mrb[19].mxu0  ;;  %s1641_s21 = scalar_lea.vmem %s2035_s27, 128 }
 0x4bb   : > { %p1642_p6 = scmp.ne.s32.totalorder %s2035_s27, %s1641_s21  ;;  %p1649_p3 = scmp.lt.s32.totalorder %s1647_s17, %s1641_s21 }
 0x4bd   : > { %p1643_p10 = pnand %p1642_p6, %p2108_p9  ;;  %p1650_p4 = por %p1649_p3, %p1648_p2 }
 0x4bf   : > { %p1644_p12 = pneg %p1643_p10 }
 0x4c1   : > { %p1651_p7 = pnand %p1650_p4, %p1644_p12 }
 0x4ff   : > { %v969_v46 = vpop.permute.xlu1 %968 }
 0x500   : > { %v978_v49 = vsel %vm525_vm2, %v633_v47, %v969_v46 }
 0x524   : > { %v972_v48 = vpop.permute.xlu0 %971 }
 0x525   : > { %v981_v50 = vsel %vm979_vm4, %v978_v49, %v972_v48 }
 0x52c   : > { %v975_v51 = vpop.permute.xlu1 %974 }
 0x52d   : > { %v984_v52 = vsel %vm982_vm5, %v981_v50, %v975_v51  ;;  %v1393_v51 = vld [vmem:[%s2087_s11] ss:$0 sm:$0xff] }
 0x52e   : > { %1490 = vmatmul.mubr.msk.bf16.vlgmr.msra.gmra.mrb[16].mxu1 %vm477_vm1, %v984_v52 }
 0x52f   : > { %1509 = vmatprep.mubr.msk.bf16.mxu1 %vm1713_vm0, %v1712_v0  ;;  %1502 = vmatpush3.bf16.msra.mxu1 %v1587_v15 }
 0x530   : > { %1503 = vmatprep.subr.bf16.mxu1 %v1712_v0 }
 0x533   : > { %1504 = vmatpush3.bf16.msra.mxu1 %v1588_v16 }
 0x534   : > { %1505 = vmatprep.subr.bf16.mxu1 %v1712_v0 }
 0x537   : > { %1506 = vmatpush3.bf16.msra.mxu1 %v1589_v17 }
 0x538   : > { %1507 = vmatprep.subr.bf16.mxu1 %v1712_v0 }
 0x53b   : > { %1508 = vmatpush3.bf16.msra.mxu1 %v1590_v18 }
 0x601   : > { %v1044_v54 = vpop.f32.mrb[16].mxu1 }
 0x602   : > { %v1045_v55 = vadd.f32 %v1377_v53, %v1044_v54  ;;  %v1491_v56 = vpop.f32.mrb[17].mxu1  ;;  %v1394_v53 = vld [vmem:[%s2088_s12] ss:$0 sm:$0xff] }
 0x603   : > { %v1047_v57 = vpop.f32.mrb[18].mxu1 }
 0x604   : > { %v1492_v58 = vpop.f32.mrb[19].mxu1  ;;  %v1050_v59 = vadd.f32 %v1045_v55, %v1899_v3 }
 0x606   : > { %v1053_v60 = vsel %vm477_vm1, %v1050_v59, 0.0 }
 0x607   : > { %1054 = vadd.xlane.f32.xlu0 %v1053_v60 }
 0x694   : > { %v1055_v61 = vpop.xlane.xlu0 %1054 }
 0x695   : > { %v1057_v62 = vmul.f32 0.03125, %v1055_v61 }
 0x697   : > { %v1058_v63 = vsub.f32 %v1050_v59, %v1057_v62 }
 0x699   : > { %v1059_v1 = vmul.f32 %v1058_v63, %v1058_v63 }
 0x69b   : > { %v1060_v2 = vsel %vm477_vm1, %v1059_v1, 0.0 }
 0x69c   : > { %1061 = vadd.xlane.f32.xlu1 %v1060_v2 }
 0x729   : > { %v1062_v6 = vpop.xlane.xlu1 %1061 }
 0x72a   : > { %v1063_v7 = vmul.f32 0.03125, %v1062_v6 }
 0x72c   : > { %v1064_v8 = vadd.f32 1e-05, %v1063_v7 }
 0x72e   : > { %1607 = vrsqrt.f32 %v1064_v8 }
 0x738   : > { %v1608_v3 = vpop.eup %1607 }
 0x739   : > { %v1066_v11 = vmul.f32 %v1608_v3, %v1058_v63 }
 0x73b   : > { %v1073_v10 = vmul.f32 %v1381_v9, %v1066_v11 }
 0x73d   : > { %v1080_v13 = vadd.f32 %v1382_v12, %v1073_v10 }
 0x73f   : > { %v1081_v14 = vpack.c.bf16 %v1080_v13, %v1080_v13 }
 0x741   : > { %1498 = vmatmul.mubr.msk.bf16.vlgmr.msra.gmra.mrb[20].mxu0 %vm477_vm1, %v1081_v14 }
 0x814   : > { %v1142_v20 = vpop.f32.mrb[20].mxu0 }
 0x815   : > { %v1143_v21 = vadd.f32 %v1383_v19, %v1142_v20  ;;  %v1499_v22 = vpop.f32.mrb[21].mxu0 }
 0x816   : > { %v1145_v23 = vpop.f32.mrb[22].mxu0 }
 0x817   : > { %v1149_v24 = vmul.f32 0.044715, %v1143_v21  ;;  %v1500_v25 = vpop.f32.mrb[23].mxu0  ;;  %v1148_v31 = vmul.f32 0.5, %v1143_v21 }
 0x819   : > { %v1150_v26 = vmul.f32 %v1149_v24, %v1143_v21 }
 0x81b   : > { %v1151_v27 = vmul.f32 %v1150_v26, %v1143_v21 }
 0x81d   : > { %v1152_v28 = vadd.f32 %v1151_v27, %v1143_v21 }
 0x81f   : > { %v1153_v29 = vmul.f32 0.7978845, %v1152_v28 }
 0x821   : > { %1609 = vtanh.f32 %v1153_v29 }
 0x82b   : > { %v1610_v30 = vpop.eup %1609 }
 0x82c   : > { %v1155_v32 = vadd.f32 1.0, %v1610_v30 }
 0x82e   : > { %v1156_v0 = vmul.f32 %v1155_v32, %v1148_v31 }
 0x830   : > { %v1157_v33 = vpack.c.bf16 %v1156_v0, %v1156_v0 }
 0x832   : > { %1510 = vmatmul.mubr.msk.bf16.vlgmr.msra.gmra.mrb[20].mxu1 %vm1197_vm6, %v1157_v33 }
 0x905   : > { %v1235_v35 = vpop.f32.mrb[20].mxu1 }
 0x906   : > { %v1236_v36 = vadd.f32 %v1387_v34, %v1235_v35  ;;  %v1511_v37 = vpop.f32.mrb[21].mxu1 }
 0x907   : > { %v1238_v38 = vpop.f32.mrb[22].mxu1 }
 0x908   : > { %v1512_v39 = vpop.f32.mrb[23].mxu1  ;;  %v1241_v40 = vadd.f32 %v1236_v36, %v1080_v13 }
 0x90a   : > { %v1244_v41 = vsel %vm477_vm1, %v1241_v40, 0.0 }
 0x90b   : > { %1245 = vadd.xlane.f32.xlu0 %v1244_v41 }
 0x998   : > { %v1246_v42 = vpop.xlane.xlu0 %1245 }
 0x999   : > { %v1247_v43 = vmul.f32 0.03125, %v1246_v42 }
 0x99b   : > { %v1248_v44 = vsub.f32 %v1241_v40, %v1247_v43 }
 0x99d   : > { %v1249_v45 = vmul.f32 %v1248_v44, %v1248_v44 }
 0x99f   : > { %v1250_v46 = vsel %vm477_vm1, %v1249_v45, 0.0 }
 0x9a0   : > { %1251 = vadd.xlane.f32.xlu0 %v1250_v46 }
 0xa2d   : > { %v1252_v47 = vpop.xlane.xlu0 %1251 }
 0xa2e   : > { %v1253_v48 = vmul.f32 0.03125, %v1252_v47 }
 0xa30   : > { %v1254_v49 = vadd.f32 1e-05, %v1253_v48 }
 0xa32   : > { %1611 = vrsqrt.f32 %v1254_v49 }
 0xa3c   : > { %v1612_v50 = vpop.eup %1611 }
 0xa3d   : > { %v1256_v52 = vmul.f32 %v1612_v50, %v1248_v44 }
 0xa3f   : > { %v1263_v54 = vmul.f32 %v1393_v51, %v1256_v52 }
 0xa41   : > { %v1270_v55 = vadd.f32 %v1394_v53, %v1263_v54 }
 0xa43   : > { %1271 = vst.msk [vmem:[%s446_s16] sm:$0xff] %vm477_vm1, %v1270_v55 }
 0xa44   : > { %1654 = shalt.err (!%p1651_p7)
}
 0xa45   : > { %s1655_s22 = scalar_lea.hbm %s2033_s0, 128  ;;  %s1659_s16 = scalar_lea.hbm %s2089_s13, 256 }
 0xa46   : > { %p1656_p8 = scmp.ne.s32.totalorder %s2033_s0, %s1655_s22  ;;  %p1660_p1 = scmp.lt.u32.totalorder %s2033_s0, %s2089_s13 }
 0xa47   : > { %p1661_p0 = scmp.lt.u32.totalorder %s1659_s16, %s1655_s22  ;;  %p1663_p6 = scmp.lt.u32.totalorder %s1655_s22, %s2033_s0 }
 0xa48   : > { %p1657_p11 = pnand %p1656_p8, %p2108_p9 }
 0xa49   : > { %p1662_p5 = por %p1661_p0, %p1660_p1 }
 0xa4a   : > { %p1658_p13 = pneg %p1657_p11 }
 0xa4b   : > { %p1664_p10 = por %p1663_p6, %p1662_p5 }
 0xa4d   : > { %p1665_p12 = pnand %p1664_p10, %p1658_p13 }
 0xa4f   : > { %1668 = shalt.err (!%p1665_p12)
}
 0xa50   : > { %1517 = dma.vmem_to_hbm [thread:$0]  (%p2108_p9), %s2035_s27, 128, %s2033_s0, %s1273_s15  }
 0xa51 PF: > { %p1529_p2 = scmp.ge.s32.totalorder %s1707_s28, 2  ;;  %s1298_s21 = sand.u32 1, %s1695_s25  }
 0xa52   : > { %p2109_p3 = scmp.ne.s32.totalorder %s2101_s19, 0  ;;  %s1299_s29 = scalar_lea.sflag [#allocation4], %s1298_s21 }
 0xa54   : > { %p1524_p4 = pnand %p1529_p2, %p2109_p3 }
 0xa56   : > { %1690 = dma.done.wait (!%p1524_p4), %s1299_s29, 128  }
 0xa57   : > { %1692 = vsyncadd (!%p1524_p4), %s1299_s29, 4294967168  ;;  %s2110_s28 = sld [smem:[#allocation9_spill]]  ;;  %s2111_s23 = sld [smem:[#allocation8_spill]] }
 0xa58   : > { %s2112_s27 = sld [smem:[#allocation10_spill]]  ;;  %s2113_s25 = smov %s1699_s26 }
 0xa5d   : > { %p24_p7 = scmp.ge.s32.totalorder %s2110_s28, 4   ;;  %s2114_s26 = smov %s2111_s23 }
 0xa5f   :  { %26 = sbr.rel (!%p24_p7) target bundleno = 6 (0x6), region = 112 }
 0xa66   :  { %1304 = vsyncpa [#allocation3], 1 }
 0xa67   :  { %1306 = vsyncpa [#allocation3 + $0x1], 1 }
 0xa68   :  { %1307 = vsyncpa [#allocation4], 1 }
 0xa69   :  { %1309 = vsyncpa [#allocation4 + $0x1], 1 }

</bundles_post_ra>
